<compile_context>
chip_gen: v6e
topology: v6e:2x2x1
jax: 0.10.0
libtpu: 0.0.40
codegen_flags: <defaults>
</compile_context>

<pallas_src>
import functools

import jax
import jax.numpy as jnp
import numpy as np
from jax.experimental import pallas as pl
from jax.experimental.pallas import tpu as pltpu


# ----------------------------------------------------------------------------
# Kernel 1: fused QKV projection + multi-head self-attention (batch folded in M)
# ----------------------------------------------------------------------------
def _qkv_attn_kernel(xp_ref, w_ref, b_ref, o_ref, *, num_heads, head_dim,
                     emd_dim, n_tokens, batch_block):
    # xp_ref : (Bb*N, K)  bf16   patch-major input rows (batch folded into M)
    # w_ref  : (K, 3E)    bf16   packed q|k|v patch-embed weights (scale folded into q)
    # b_ref  : (1, 3E)    f32    packed biases (scale folded into bq)
    # o_ref  : (Bb*N, E)  f32    attention output, heads concatenated (torch order)
    E, hd, N = emd_dim, head_dim, n_tokens

    # One MXU matmul for q,k,v of every row in the block (bf16 in, fp32 accumulate).
    qkv = jnp.dot(xp_ref[...], w_ref[...],
                  preferred_element_type=jnp.float32) + b_ref[...]      # (Bb*N, 3E)

    for b in range(batch_block):          # unrolled; row slices are 8-sublane aligned
        r0 = b * N
        for h in range(num_heads):        # unrolled: all heads in one grid step
            c0 = h * hd
            q = qkv[r0:r0 + N, c0:c0 + hd].astype(jnp.bfloat16)          # scale pre-folded
            k = qkv[r0:r0 + N, E + c0:E + c0 + hd].astype(jnp.bfloat16)
            v = qkv[r0:r0 + N, 2 * E + c0:2 * E + c0 + hd].astype(jnp.bfloat16)
            # q @ k^T on the MXU in bf16 (contract both last dims, no transpose).
            s = jax.lax.dot_general(q, k, (((1,), (1,)), ((), ())),
                                    preferred_element_type=jnp.float32)  # (N, N) f32
            s = s - jnp.max(s, axis=-1, keepdims=True)
            p = jnp.exp(s)
            p = p * pl.reciprocal(jnp.sum(p, axis=-1, keepdims=True), approx=True)
            o = jnp.dot(p.astype(jnp.bfloat16), v,
                        preferred_element_type=jnp.float32)              # (N, hd) f32
            # Write straight into the VMEM output block; the HBM writeback at the end
            # of the grid step is one lane-dense (Bb*N, E) store.
            o_ref[r0:r0 + N, c0:c0 + hd] = o


def fused_qkv_attention(xp_flat, wqkv, bqkv, *, num_heads, n_tokens, batch_block):
    """xp_flat: (B*N, K) bf16, wqkv: (K, 3E) bf16, bqkv: (1, 3E) f32 -> (B*N, E) f32."""
    BN, K = xp_flat.shape
    E3 = wqkv.shape[1]
    E = E3 // 3
    rows = batch_block * n_tokens
    kernel = functools.partial(_qkv_attn_kernel, num_heads=num_heads,
                               head_dim=E // num_heads, emd_dim=E,
                               n_tokens=n_tokens, batch_block=batch_block)
    return pl.pallas_call(
        kernel,
        out_shape=jax.ShapeDtypeStruct((BN, E), jnp.float32),
        grid=(BN // rows,),
        in_specs=[
            pl.BlockSpec((rows, K), lambda i: (i, 0)),
            pl.BlockSpec((K, E3), lambda i: (0, 0)),
            pl.BlockSpec((1, E3), lambda i: (0, 0)),
        ],
        out_specs=pl.BlockSpec((rows, E), lambda i: (i, 0)),
        compiler_params=pltpu.CompilerParams(
            dimension_semantics=("parallel",)),
    )(xp_flat, wqkv, bqkv)


# ----------------------------------------------------------------------------
# Kernel 2: residual add + 3x3x3 Conv3d (stride 1, pad 1), Bb batches per block
# ----------------------------------------------------------------------------
def _residual_conv3x3x3_kernel(y_ref, xres_ref, mask_ref, w2_ref, o_ref, *, D, WD):
    # y_ref    : (Cb, HWD)    f32  attention output, channels-major flat spatial
    # xres_ref : (Cb, HWD)    f32  residual (same flat layout)
    # mask_ref : (6, HWD)     f32  [d>=1, d<=D-2, w>=1, w<=W-2, h>=1, h<=H-2]
    # w2_ref   : (Cb, 28*Cb)  f32  per-tap block-diagonal weights + folded bias block
    # o_ref    : (Cb, HWD)    f32
    y = y_ref[...] + xres_ref[...]                                       # residual add
    Cb, HWD = y.shape

    m = mask_ref[...]
    mx_lo, mx_hi = m[0:1], m[1:2]
    my_lo, my_hi = m[2:3], m[3:4]
    mz_lo, mz_hi = m[4:5], m[5:6]

    # Hierarchical shifted-tap stack: 2+2+2 lane rolls instead of 26 independent
    # rolls; boundary masks are applied once per level (wrapped lanes are always
    # zeroed by that level's mask, so the result matches per-tap masking exactly).
    s0 = jnp.concatenate(
        [jnp.roll(y, 1, axis=1) * mx_lo, y, jnp.roll(y, -1, axis=1) * mx_hi], axis=0)
    s1 = jnp.concatenate(
        [jnp.roll(s0, D, axis=1) * my_lo, s0, jnp.roll(s0, -D, axis=1) * my_hi], axis=0)
    s2 = jnp.concatenate(
        [jnp.roll(s1, WD, axis=1) * mz_lo, s1, jnp.roll(s1, -WD, axis=1) * mz_hi], axis=0)

    ones = jnp.ones((Cb, HWD), jnp.float32)               # bias is folded into w2
    stacked = jnp.concatenate([s2, ones], axis=0)         # (28*Cb, HWD)

    # Single K=28*Cb contraction instead of 27 tiny (C,C)@(C,HWD) matmuls.
    o_ref[...] = jax.lax.dot_general(
        w2_ref[...], stacked, (((1,), (0,)), ((), ())),
        preferred_element_type=jnp.float32)


def residual_conv3x3x3(y_flat, x_flat, masks, w2, *, D, WD, batch_block, C):
    """y_flat/x_flat: (B*C, HWD) f32, masks: (6, HWD) f32, w2: (Bb*C, 28*Bb*C) f32."""
    BC, HWD = y_flat.shape
    Cb = batch_block * C
    kernel = functools.partial(_residual_conv3x3x3_kernel, D=D, WD=WD)
    return pl.pallas_call(
        kernel,
        out_shape=jax.ShapeDtypeStruct((BC, HWD), jnp.float32),
        grid=(BC // Cb,),
        in_specs=[
            pl.BlockSpec((Cb, HWD), lambda i: (i, 0)),
            pl.BlockSpec((Cb, HWD), lambda i: (i, 0)),
            pl.BlockSpec((6, HWD), lambda i: (0, 0)),
            pl.BlockSpec((Cb, 28 * Cb), lambda i: (0, 0)),
        ],
        out_specs=pl.BlockSpec((Cb, HWD), lambda i: (i, 0)),
        compiler_params=pltpu.CompilerParams(
            dimension_semantics=("parallel",)),
    )(y_flat, x_flat, masks, w2)


# ----------------------------------------------------------------------------
# Forward pass (host glue is layout/packing only; compute lives in the kernels)
# ----------------------------------------------------------------------------
def transformer_block_single(x, params, patch_size=4, num_heads=4):
    B, C, H, W, D = x.shape
    p = patch_size
    E = C * p ** 3                       # emd_dim
    K = C * p ** 3                       # patch-embed contraction dim
    N = (H * W * D) // p ** 3            # number of patches
    HWD = H * W * D
    hd = E // num_heads
    scale = hd ** (-0.5)
    bb = 2 if B % 2 == 0 else 1          # batches folded per grid step (fills sublanes)
    Cb = bb * C

    # ---- patch extraction (== strided Conv3d(kernel=p, stride=p) as a matmul) ----
    xp = x.reshape(B, C, H // p, p, W // p, p, D // p, p)
    xp = xp.transpose(0, 2, 4, 6, 1, 3, 5, 7).reshape(B * N, K)

    # ---- QKV weight packing: attention scale folded into q weights/bias ----
    wq = params["wq"].reshape(E, K).T * scale
    wk = params["wk"].reshape(E, K).T
    wv = params["wv"].reshape(E, K).T
    wqkv = jnp.concatenate([wq, wk, wv], axis=1).astype(jnp.bfloat16)     # (K, 3E)
    bqkv = jnp.concatenate([params["bq"] * scale, params["bk"], params["bv"]]
                           ).reshape(1, 3 * E).astype(jnp.float32)

    # Kernel 1: QKV + MHSA (batch folded into the MXU M dim).
    y = fused_qkv_attention(xp.astype(jnp.bfloat16), wqkv, bqkv,
                            num_heads=num_heads, n_tokens=N,
                            batch_block=bb)                               # (B*N, E) f32

    # (B*N, E) -> (B*C, HWD) is a free flat reinterpretation (N*E == C*HWD per batch).
    # TODO(synk): fusing kernel 2 into kernel 1 would need this lane-crossing reshape
    # inside the kernel (Mosaic relayout risk); kept as two lane-dense pallas_calls.
    y_flat = y.reshape(B * C, HWD)
    x_flat = x.reshape(B * C, HWD).astype(jnp.float32)

    # ---- conv weights: per-tap block-diag over the bb stacked batches + bias fold ----
    w_taps = params["w_out"].transpose(2, 3, 4, 0, 1).reshape(27, C, C)   # tap t=(dz+1)*9+(dy+1)*3+(dx+1)
    eye_bb = jnp.eye(bb, dtype=w_taps.dtype)
    w_bd = jnp.einsum("ab,tij->taibj", eye_bb, w_taps).reshape(27, Cb, Cb)
    w2_main = w_bd.transpose(1, 0, 2).reshape(Cb, 27 * Cb)
    bias_rep = jnp.tile(params["b_out"], bb)[:, None]                      # (Cb, 1)
    bias_block = jnp.concatenate(
        [bias_rep, jnp.zeros((Cb, Cb - 1), w_taps.dtype)], axis=1)         # (Cb, Cb)
    w2 = jnp.concatenate([w2_main, bias_block], axis=1).astype(jnp.float32)  # (Cb, 28*Cb)

    # ---- boundary masks precomputed on the host (no iota / div / mod in-kernel) ----
    pos = jnp.arange(HWD)
    d_ = pos % D
    w_ = (pos // D) % W
    h_ = pos // (W * D)
    masks = jnp.stack([d_ >= 1, d_ <= D - 2,
                       w_ >= 1, w_ <= W - 2,
                       h_ >= 1, h_ <= H - 2]).astype(jnp.float32)          # (6, HWD)

    # Kernel 2: residual + 3x3x3 conv on a sublane-filled (Bb*C, HWD) slab.
    out = residual_conv3x3x3(y_flat, x_flat, masks, w2,
                             D=D, WD=W * D, batch_block=bb, C=C)           # (B*C, HWD)
    return out.reshape(B, C, H, W, D)


# ----------------------------------------------------------------------------
# Pure-JAX reference (mirrors the PyTorch module exactly) for verification
# ----------------------------------------------------------------------------
def _conv3d(x, w, b, stride, padding):
    dn = jax.lax.conv_dimension_numbers(x.shape, w.shape, ("NCHWD", "OIHWD", "NCHWD"))
    out = jax.lax.conv_general_dilated(
        x, w, window_strides=(stride,) * 3,
        padding=[(padding, padding)] * 3, dimension_numbers=dn)
    return out + b.reshape(1, -1, 1, 1, 1)


def ref_forward(x, params, patch_size=4, num_heads=4):
    B, C, H, W, D = x.shape
    p = patch_size
    E = C * p ** 3
    N = (H * W * D) // p ** 3
    hd = E // num_heads
    scale = hd ** (-0.5)

    q = _conv3d(x, params["wq"], params["bq"], p, 0)
    k = _conv3d(x, params["wk"], params["bk"], p, 0)
    v = _conv3d(x, params["wv"], params["bv"], p, 0)

    def prep(t):
        t = t.reshape(B, E, N).transpose(0, 2, 1)
        return t.reshape(B, N, num_heads, hd).transpose(0, 2, 1, 3)

    q, k, v = prep(q), prep(k), prep(v)
    attn = jnp.einsum("bhnd,bhmd->bhnm", q, k) * scale
    attn = jax.nn.softmax(attn, axis=-1)
    y = jnp.einsum("bhnm,bhmd->bhnd", attn, v)
    y = y.transpose(0, 2, 1, 3).reshape(B, N, E).reshape(B, C, H, W, D)
    y = y + x
    return _conv3d(y, params["w_out"], params["b_out"], 1, 1)


# ----------------------------------------------------------------------------
if __name__ == "__main__":
    B, C, H, W, D = 2, 4, 8, 8, 8
    p, nh = 4, 4
    E = C * p ** 3

    key = jax.random.PRNGKey(0)
    keys = jax.random.split(key, 9)
    x = jax.random.normal(keys[0], (B, C, H, W, D), jnp.float32)
    params = {
        "wq": jax.random.normal(keys[1], (E, C, p, p, p), jnp.float32) * 0.05,
        "bq": jax.random.normal(keys[2], (E,), jnp.float32) * 0.05,
        "wk": jax.random.normal(keys[3], (E, C, p, p, p), jnp.float32) * 0.05,
        "bk": jax.random.normal(keys[4], (E,), jnp.float32) * 0.05,
        "wv": jax.random.normal(keys[5], (E, C, p, p, p), jnp.float32) * 0.05,
        "bv": jax.random.normal(keys[6], (E,), jnp.float32) * 0.05,
        "w_out": jax.random.normal(keys[7], (C, C, 3, 3, 3), jnp.float32) * 0.05,
        "b_out": jax.random.normal(keys[8], (C,), jnp.float32) * 0.05,
    }

    fwd = jax.jit(functools.partial(transformer_block_single, patch_size=p, num_heads=nh))
    out = jax.block_until_ready(fwd(x, params))
    assert out.shape == (B, C, H, W, D)

    ref = jax.block_until_ready(
        jax.jit(functools.partial(ref_forward, patch_size=p, num_heads=nh))(x, params))
    # bf16 patch-embed + bf16 attention matmuls (fp32 accumulation); softmax and the
    # conv contraction stay fp32, so errors remain at the few-1e-3 level.
    np.testing.assert_allclose(np.asarray(out), np.asarray(ref), rtol=5e-2, atol=5e-2)

    print("KERNEL_OK")
</pallas_src>

<mosaic_0001>
module attributes {stable_mosaic.version = 11 : i64} {
  func.func @_qkv_attn_kernel(%arg0: i32, %arg1: memref<16x256xbf16, #tpu.memory_space<vmem>>, %arg2: memref<256x768xbf16, #tpu.memory_space<vmem>>, %arg3: memref<1x768xf32, #tpu.memory_space<vmem>>, %arg4: memref<16x256xf32, #tpu.memory_space<vmem>>) attributes {dimension_semantics = [#tpu.dimension_semantics<parallel>], iteration_bounds = array<i64: 1>, scalar_prefetch = 0 : i64, scratch_operands = 0 : i64, tpu.core_type = #tpu.core_type<tc>, window_params = [{transform_indices = @transform_0, window_bounds = array<i64: 16, 256>}, {pipeline_mode = #tpu.pipeline_mode<synchronous>, transform_indices = @transform_1, window_bounds = array<i64: 256, 768>}, {pipeline_mode = #tpu.pipeline_mode<synchronous>, transform_indices = @transform_2, window_bounds = array<i64: 1, 768>}, {transform_indices = @transform_3, window_bounds = array<i64: 16, 256>}]} {
    %c0 = arith.constant 0 : index
    %c0_0 = arith.constant 0 : index
    %0 = vector.load %arg1[%c0, %c0_0] : memref<16x256xbf16, #tpu.memory_space<vmem>>, vector<16x256xbf16>
    %c0_1 = arith.constant 0 : index
    %c0_2 = arith.constant 0 : index
    %1 = vector.load %arg2[%c0_1, %c0_2] : memref<256x768xbf16, #tpu.memory_space<vmem>>, vector<256x768xbf16>
    %cst = arith.constant dense<0.000000e+00> : vector<16x768xf32>
    %2 = tpu.matmul %0, %1, %cst {dimension_numbers = #tpu.dot_dimension_numbers<[1], [0], [0], [1], [0, 0, 1, 1], [], []>} : vector<16x256xbf16>, vector<256x768xbf16>, vector<16x768xf32> -> vector<16x768xf32>
    %c0_3 = arith.constant 0 : index
    %c0_4 = arith.constant 0 : index
    %3 = vector.load %arg3[%c0_3, %c0_4] : memref<1x768xf32, #tpu.memory_space<vmem>>, vector<1x768xf32>
    %4 = vector.broadcast %3 : vector<1x768xf32> to vector<16x768xf32>
    %5 = arith.addf %2, %4 : vector<16x768xf32>
    %6 = vector.extract_strided_slice %5 {offsets = [0, 0], sizes = [8, 64], strides = [1, 1]} : vector<16x768xf32> to vector<8x64xf32>
    %7 = arith.truncf %6 : vector<8x64xf32> to vector<8x64xbf16>
    %8 = vector.extract_strided_slice %5 {offsets = [0, 256], sizes = [8, 64], strides = [1, 1]} : vector<16x768xf32> to vector<8x64xf32>
    %9 = arith.truncf %8 : vector<8x64xf32> to vector<8x64xbf16>
    %10 = vector.extract_strided_slice %5 {offsets = [0, 512], sizes = [8, 64], strides = [1, 1]} : vector<16x768xf32> to vector<8x64xf32>
    %11 = arith.truncf %10 : vector<8x64xf32> to vector<8x64xbf16>
    %cst_5 = arith.constant dense<0.000000e+00> : vector<8x8xf32>
    %12 = tpu.matmul %7, %9, %cst_5 {dimension_numbers = #tpu.dot_dimension_numbers<[1], [1], [0], [0], [0, 0, 1, 0], [], []>} : vector<8x64xbf16>, vector<8x64xbf16>, vector<8x8xf32> -> vector<8x8xf32>
    %cst_6 = arith.constant dense<0xFF800000> : vector<8xf32>
    %13 = vector.multi_reduction <maximumf>, %12, %cst_6 [1] : vector<8x8xf32> to vector<8xf32>
    %14 = vector.shape_cast %13 : vector<8xf32> to vector<8x1xf32>
    %15 = vector.broadcast %14 : vector<8x1xf32> to vector<8x8xf32>
    %16 = arith.subf %12, %15 : vector<8x8xf32>
    %17 = math.exp %16 : vector<8x8xf32>
    %cst_7 = arith.constant dense<0.000000e+00> : vector<8xf32>
    %18 = vector.multi_reduction <add>, %17, %cst_7 [1] : vector<8x8xf32> to vector<8xf32>
    %19 = vector.shape_cast %18 : vector<8xf32> to vector<8x1xf32>
    %20 = tpu.reciprocal %19 {approx = true} : vector<8x1xf32> -> vector<8x1xf32>
    %21 = vector.broadcast %20 : vector<8x1xf32> to vector<8x8xf32>
    %22 = arith.mulf %17, %21 : vector<8x8xf32>
    %23 = arith.truncf %22 : vector<8x8xf32> to vector<8x8xbf16>
    %cst_8 = arith.constant dense<0.000000e+00> : vector<8x64xf32>
    %24 = tpu.matmul %23, %11, %cst_8 {dimension_numbers = #tpu.dot_dimension_numbers<[1], [0], [0], [1], [0, 0, 1, 1], [], []>} : vector<8x8xbf16>, vector<8x64xbf16>, vector<8x64xf32> -> vector<8x64xf32>
    %c0_9 = arith.constant 0 : index
    %c0_10 = arith.constant 0 : index
    %25 = vector.load %arg4[%c0_9, %c0_10] : memref<16x256xf32, #tpu.memory_space<vmem>>, vector<8x64xf32>
    tpu.vector_store %arg4[%c0_9, %c0_10], %24 {strides = array<i32>} : memref<16x256xf32, #tpu.memory_space<vmem>>, vector<8x64xf32>,
    %26 = vector.extract_strided_slice %5 {offsets = [0, 64], sizes = [8, 64], strides = [1, 1]} : vector<16x768xf32> to vector<8x64xf32>
    %27 = arith.truncf %26 : vector<8x64xf32> to vector<8x64xbf16>
    %28 = vector.extract_strided_slice %5 {offsets = [0, 320], sizes = [8, 64], strides = [1, 1]} : vector<16x768xf32> to vector<8x64xf32>
    %29 = arith.truncf %28 : vector<8x64xf32> to vector<8x64xbf16>
    %30 = vector.extract_strided_slice %5 {offsets = [0, 576], sizes = [8, 64], strides = [1, 1]} : vector<16x768xf32> to vector<8x64xf32>
    %31 = arith.truncf %30 : vector<8x64xf32> to vector<8x64xbf16>
    %cst_11 = arith.constant dense<0.000000e+00> : vector<8x8xf32>
    %32 = tpu.matmul %27, %29, %cst_11 {dimension_numbers = #tpu.dot_dimension_numbers<[1], [1], [0], [0], [0, 0, 1, 0], [], []>} : vector<8x64xbf16>, vector<8x64xbf16>, vector<8x8xf32> -> vector<8x8xf32>
    %cst_12 = arith.constant dense<0xFF800000> : vector<8xf32>
    %33 = vector.multi_reduction <maximumf>, %32, %cst_12 [1] : vector<8x8xf32> to vector<8xf32>
    %34 = vector.shape_cast %33 : vector<8xf32> to vector<8x1xf32>
    %35 = vector.broadcast %34 : vector<8x1xf32> to vector<8x8xf32>
    %36 = arith.subf %32, %35 : vector<8x8xf32>
    %37 = math.exp %36 : vector<8x8xf32>
    %cst_13 = arith.constant dense<0.000000e+00> : vector<8xf32>
    %38 = vector.multi_reduction <add>, %37, %cst_13 [1] : vector<8x8xf32> to vector<8xf32>
    %39 = vector.shape_cast %38 : vector<8xf32> to vector<8x1xf32>
    %40 = tpu.reciprocal %39 {approx = true} : vector<8x1xf32> -> vector<8x1xf32>
    %41 = vector.broadcast %40 : vector<8x1xf32> to vector<8x8xf32>
    %42 = arith.mulf %37, %41 : vector<8x8xf32>
    %43 = arith.truncf %42 : vector<8x8xf32> to vector<8x8xbf16>
    %cst_14 = arith.constant dense<0.000000e+00> : vector<8x64xf32>
    %44 = tpu.matmul %43, %31, %cst_14 {dimension_numbers = #tpu.dot_dimension_numbers<[1], [0], [0], [1], [0, 0, 1, 1], [], []>} : vector<8x8xbf16>, vector<8x64xbf16>, vector<8x64xf32> -> vector<8x64xf32>
    %c0_15 = arith.constant 0 : index
    %c64 = arith.constant 64 : index
    %45 = vector.load %arg4[%c0_15, %c64] : memref<16x256xf32, #tpu.memory_space<vmem>>, vector<8x64xf32>
    tpu.vector_store %arg4[%c0_15, %c64], %44 {strides = array<i32>} : memref<16x256xf32, #tpu.memory_space<vmem>>, vector<8x64xf32>,
    %46 = vector.extract_strided_slice %5 {offsets = [0, 128], sizes = [8, 64], strides = [1, 1]} : vector<16x768xf32> to vector<8x64xf32>
    %47 = arith.truncf %46 : vector<8x64xf32> to vector<8x64xbf16>
    %48 = vector.extract_strided_slice %5 {offsets = [0, 384], sizes = [8, 64], strides = [1, 1]} : vector<16x768xf32> to vector<8x64xf32>
    %49 = arith.truncf %48 : vector<8x64xf32> to vector<8x64xbf16>
    %50 = vector.extract_strided_slice %5 {offsets = [0, 640], sizes = [8, 64], strides = [1, 1]} : vector<16x768xf32> to vector<8x64xf32>
    %51 = arith.truncf %50 : vector<8x64xf32> to vector<8x64xbf16>
    %cst_16 = arith.constant dense<0.000000e+00> : vector<8x8xf32>
    %52 = tpu.matmul %47, %49, %cst_16 {dimension_numbers = #tpu.dot_dimension_numbers<[1], [1], [0], [0], [0, 0, 1, 0], [], []>} : vector<8x64xbf16>, vector<8x64xbf16>, vector<8x8xf32> -> vector<8x8xf32>
    %cst_17 = arith.constant dense<0xFF800000> : vector<8xf32>
    %53 = vector.multi_reduction <maximumf>, %52, %cst_17 [1] : vector<8x8xf32> to vector<8xf32>
    %54 = vector.shape_cast %53 : vector<8xf32> to vector<8x1xf32>
    %55 = vector.broadcast %54 : vector<8x1xf32> to vector<8x8xf32>
    %56 = arith.subf %52, %55 : vector<8x8xf32>
    %57 = math.exp %56 : vector<8x8xf32>
    %cst_18 = arith.constant dense<0.000000e+00> : vector<8xf32>
    %58 = vector.multi_reduction <add>, %57, %cst_18 [1] : vector<8x8xf32> to vector<8xf32>
    %59 = vector.shape_cast %58 : vector<8xf32> to vector<8x1xf32>
    %60 = tpu.reciprocal %59 {approx = true} : vector<8x1xf32> -> vector<8x1xf32>
    %61 = vector.broadcast %60 : vector<8x1xf32> to vector<8x8xf32>
    %62 = arith.mulf %57, %61 : vector<8x8xf32>
    %63 = arith.truncf %62 : vector<8x8xf32> to vector<8x8xbf16>
    %cst_19 = arith.constant dense<0.000000e+00> : vector<8x64xf32>
    %64 = tpu.matmul %63, %51, %cst_19 {dimension_numbers = #tpu.dot_dimension_numbers<[1], [0], [0], [1], [0, 0, 1, 1], [], []>} : vector<8x8xbf16>, vector<8x64xbf16>, vector<8x64xf32> -> vector<8x64xf32>
    %c0_20 = arith.constant 0 : index
    %c128 = arith.constant 128 : index
    %65 = vector.load %arg4[%c0_20, %c128] : memref<16x256xf32, #tpu.memory_space<vmem>>, vector<8x64xf32>
    tpu.vector_store %arg4[%c0_20, %c128], %64 {strides = array<i32>} : memref<16x256xf32, #tpu.memory_space<vmem>>, vector<8x64xf32>,
    %66 = vector.extract_strided_slice %5 {offsets = [0, 192], sizes = [8, 64], strides = [1, 1]} : vector<16x768xf32> to vector<8x64xf32>
    %67 = arith.truncf %66 : vector<8x64xf32> to vector<8x64xbf16>
    %68 = vector.extract_strided_slice %5 {offsets = [0, 448], sizes = [8, 64], strides = [1, 1]} : vector<16x768xf32> to vector<8x64xf32>
    %69 = arith.truncf %68 : vector<8x64xf32> to vector<8x64xbf16>
    %70 = vector.extract_strided_slice %5 {offsets = [0, 704], sizes = [8, 64], strides = [1, 1]} : vector<16x768xf32> to vector<8x64xf32>
    %71 = arith.truncf %70 : vector<8x64xf32> to vector<8x64xbf16>
    %cst_21 = arith.constant dense<0.000000e+00> : vector<8x8xf32>
    %72 = tpu.matmul %67, %69, %cst_21 {dimension_numbers = #tpu.dot_dimension_numbers<[1], [1], [0], [0], [0, 0, 1, 0], [], []>} : vector<8x64xbf16>, vector<8x64xbf16>, vector<8x8xf32> -> vector<8x8xf32>
    %cst_22 = arith.constant dense<0xFF800000> : vector<8xf32>
    %73 = vector.multi_reduction <maximumf>, %72, %cst_22 [1] : vector<8x8xf32> to vector<8xf32>
    %74 = vector.shape_cast %73 : vector<8xf32> to vector<8x1xf32>
    %75 = vector.broadcast %74 : vector<8x1xf32> to vector<8x8xf32>
    %76 = arith.subf %72, %75 : vector<8x8xf32>
    %77 = math.exp %76 : vector<8x8xf32>
    %cst_23 = arith.constant dense<0.000000e+00> : vector<8xf32>
    %78 = vector.multi_reduction <add>, %77, %cst_23 [1] : vector<8x8xf32> to vector<8xf32>
    %79 = vector.shape_cast %78 : vector<8xf32> to vector<8x1xf32>
    %80 = tpu.reciprocal %79 {approx = true} : vector<8x1xf32> -> vector<8x1xf32>
    %81 = vector.broadcast %80 : vector<8x1xf32> to vector<8x8xf32>
    %82 = arith.mulf %77, %81 : vector<8x8xf32>
    %83 = arith.truncf %82 : vector<8x8xf32> to vector<8x8xbf16>
    %cst_24 = arith.constant dense<0.000000e+00> : vector<8x64xf32>
    %84 = tpu.matmul %83, %71, %cst_24 {dimension_numbers = #tpu.dot_dimension_numbers<[1], [0], [0], [1], [0, 0, 1, 1], [], []>} : vector<8x8xbf16>, vector<8x64xbf16>, vector<8x64xf32> -> vector<8x64xf32>
    %c0_25 = arith.constant 0 : index
    %c192 = arith.constant 192 : index
    %85 = vector.load %arg4[%c0_25, %c192] : memref<16x256xf32, #tpu.memory_space<vmem>>, vector<8x64xf32>
    tpu.vector_store %arg4[%c0_25, %c192], %84 {strides = array<i32>} : memref<16x256xf32, #tpu.memory_space<vmem>>, vector<8x64xf32>,
    %86 = vector.extract_strided_slice %5 {offsets = [8, 0], sizes = [8, 64], strides = [1, 1]} : vector<16x768xf32> to vector<8x64xf32>
    %87 = arith.truncf %86 : vector<8x64xf32> to vector<8x64xbf16>
    %88 = vector.extract_strided_slice %5 {offsets = [8, 256], sizes = [8, 64], strides = [1, 1]} : vector<16x768xf32> to vector<8x64xf32>
    %89 = arith.truncf %88 : vector<8x64xf32> to vector<8x64xbf16>
    %90 = vector.extract_strided_slice %5 {offsets = [8, 512], sizes = [8, 64], strides = [1, 1]} : vector<16x768xf32> to vector<8x64xf32>
    %91 = arith.truncf %90 : vector<8x64xf32> to vector<8x64xbf16>
    %cst_26 = arith.constant dense<0.000000e+00> : vector<8x8xf32>
    %92 = tpu.matmul %87, %89, %cst_26 {dimension_numbers = #tpu.dot_dimension_numbers<[1], [1], [0], [0], [0, 0, 1, 0], [], []>} : vector<8x64xbf16>, vector<8x64xbf16>, vector<8x8xf32> -> vector<8x8xf32>
    %cst_27 = arith.constant dense<0xFF800000> : vector<8xf32>
    %93 = vector.multi_reduction <maximumf>, %92, %cst_27 [1] : vector<8x8xf32> to vector<8xf32>
    %94 = vector.shape_cast %93 : vector<8xf32> to vector<8x1xf32>
    %95 = vector.broadcast %94 : vector<8x1xf32> to vector<8x8xf32>
    %96 = arith.subf %92, %95 : vector<8x8xf32>
    %97 = math.exp %96 : vector<8x8xf32>
    %cst_28 = arith.constant dense<0.000000e+00> : vector<8xf32>
    %98 = vector.multi_reduction <add>, %97, %cst_28 [1] : vector<8x8xf32> to vector<8xf32>
    %99 = vector.shape_cast %98 : vector<8xf32> to vector<8x1xf32>
    %100 = tpu.reciprocal %99 {approx = true} : vector<8x1xf32> -> vector<8x1xf32>
    %101 = vector.broadcast %100 : vector<8x1xf32> to vector<8x8xf32>
    %102 = arith.mulf %97, %101 : vector<8x8xf32>
    %103 = arith.truncf %102 : vector<8x8xf32> to vector<8x8xbf16>
    %cst_29 = arith.constant dense<0.000000e+00> : vector<8x64xf32>
    %104 = tpu.matmul %103, %91, %cst_29 {dimension_numbers = #tpu.dot_dimension_numbers<[1], [0], [0], [1], [0, 0, 1, 1], [], []>} : vector<8x8xbf16>, vector<8x64xbf16>, vector<8x64xf32> -> vector<8x64xf32>
    %c8 = arith.constant 8 : index
    %c0_30 = arith.constant 0 : index
    %105 = vector.load %arg4[%c8, %c0_30] : memref<16x256xf32, #tpu.memory_space<vmem>>, vector<8x64xf32>
    tpu.vector_store %arg4[%c8, %c0_30], %104 {strides = array<i32>} : memref<16x256xf32, #tpu.memory_space<vmem>>, vector<8x64xf32>,
    %106 = vector.extract_strided_slice %5 {offsets = [8, 64], sizes = [8, 64], strides = [1, 1]} : vector<16x768xf32> to vector<8x64xf32>
    %107 = arith.truncf %106 : vector<8x64xf32> to vector<8x64xbf16>
    %108 = vector.extract_strided_slice %5 {offsets = [8, 320], sizes = [8, 64], strides = [1, 1]} : vector<16x768xf32> to vector<8x64xf32>
    %109 = arith.truncf %108 : vector<8x64xf32> to vector<8x64xbf16>
    %110 = vector.extract_strided_slice %5 {offsets = [8, 576], sizes = [8, 64], strides = [1, 1]} : vector<16x768xf32> to vector<8x64xf32>
    %111 = arith.truncf %110 : vector<8x64xf32> to vector<8x64xbf16>
    %cst_31 = arith.constant dense<0.000000e+00> : vector<8x8xf32>
    %112 = tpu.matmul %107, %109, %cst_31 {dimension_numbers = #tpu.dot_dimension_numbers<[1], [1], [0], [0], [0, 0, 1, 0], [], []>} : vector<8x64xbf16>, vector<8x64xbf16>, vector<8x8xf32> -> vector<8x8xf32>
    %cst_32 = arith.constant dense<0xFF800000> : vector<8xf32>
    %113 = vector.multi_reduction <maximumf>, %112, %cst_32 [1] : vector<8x8xf32> to vector<8xf32>
    %114 = vector.shape_cast %113 : vector<8xf32> to vector<8x1xf32>
    %115 = vector.broadcast %114 : vector<8x1xf32> to vector<8x8xf32>
    %116 = arith.subf %112, %115 : vector<8x8xf32>
    %117 = math.exp %116 : vector<8x8xf32>
    %cst_33 = arith.constant dense<0.000000e+00> : vector<8xf32>
    %118 = vector.multi_reduction <add>, %117, %cst_33 [1] : vector<8x8xf32> to vector<8xf32>
    %119 = vector.shape_cast %118 : vector<8xf32> to vector<8x1xf32>
    %120 = tpu.reciprocal %119 {approx = true} : vector<8x1xf32> -> vector<8x1xf32>
    %121 = vector.broadcast %120 : vector<8x1xf32> to vector<8x8xf32>
    %122 = arith.mulf %117, %121 : vector<8x8xf32>
    %123 = arith.truncf %122 : vector<8x8xf32> to vector<8x8xbf16>
    %cst_34 = arith.constant dense<0.000000e+00> : vector<8x64xf32>
    %124 = tpu.matmul %123, %111, %cst_34 {dimension_numbers = #tpu.dot_dimension_numbers<[1], [0], [0], [1], [0, 0, 1, 1], [], []>} : vector<8x8xbf16>, vector<8x64xbf16>, vector<8x64xf32> -> vector<8x64xf32>
    %c8_35 = arith.constant 8 : index
    %c64_36 = arith.constant 64 : index
    %125 = vector.load %arg4[%c8_35, %c64_36] : memref<16x256xf32, #tpu.memory_space<vmem>>, vector<8x64xf32>
    tpu.vector_store %arg4[%c8_35, %c64_36], %124 {strides = array<i32>} : memref<16x256xf32, #tpu.memory_space<vmem>>, vector<8x64xf32>,
    %126 = vector.extract_strided_slice %5 {offsets = [8, 128], sizes = [8, 64], strides = [1, 1]} : vector<16x768xf32> to vector<8x64xf32>
    %127 = arith.truncf %126 : vector<8x64xf32> to vector<8x64xbf16>
    %128 = vector.extract_strided_slice %5 {offsets = [8, 384], sizes = [8, 64], strides = [1, 1]} : vector<16x768xf32> to vector<8x64xf32>
    %129 = arith.truncf %128 : vector<8x64xf32> to vector<8x64xbf16>
    %130 = vector.extract_strided_slice %5 {offsets = [8, 640], sizes = [8, 64], strides = [1, 1]} : vector<16x768xf32> to vector<8x64xf32>
    %131 = arith.truncf %130 : vector<8x64xf32> to vector<8x64xbf16>
    %cst_37 = arith.constant dense<0.000000e+00> : vector<8x8xf32>
    %132 = tpu.matmul %127, %129, %cst_37 {dimension_numbers = #tpu.dot_dimension_numbers<[1], [1], [0], [0], [0, 0, 1, 0], [], []>} : vector<8x64xbf16>, vector<8x64xbf16>, vector<8x8xf32> -> vector<8x8xf32>
    %cst_38 = arith.constant dense<0xFF800000> : vector<8xf32>
    %133 = vector.multi_reduction <maximumf>, %132, %cst_38 [1] : vector<8x8xf32> to vector<8xf32>
    %134 = vector.shape_cast %133 : vector<8xf32> to vector<8x1xf32>
    %135 = vector.broadcast %134 : vector<8x1xf32> to vector<8x8xf32>
    %136 = arith.subf %132, %135 : vector<8x8xf32>
    %137 = math.exp %136 : vector<8x8xf32>
    %cst_39 = arith.constant dense<0.000000e+00> : vector<8xf32>
    %138 = vector.multi_reduction <add>, %137, %cst_39 [1] : vector<8x8xf32> to vector<8xf32>
    %139 = vector.shape_cast %138 : vector<8xf32> to vector<8x1xf32>
    %140 = tpu.reciprocal %139 {approx = true} : vector<8x1xf32> -> vector<8x1xf32>
    %141 = vector.broadcast %140 : vector<8x1xf32> to vector<8x8xf32>
    %142 = arith.mulf %137, %141 : vector<8x8xf32>
    %143 = arith.truncf %142 : vector<8x8xf32> to vector<8x8xbf16>
    %cst_40 = arith.constant dense<0.000000e+00> : vector<8x64xf32>
    %144 = tpu.matmul %143, %131, %cst_40 {dimension_numbers = #tpu.dot_dimension_numbers<[1], [0], [0], [1], [0, 0, 1, 1], [], []>} : vector<8x8xbf16>, vector<8x64xbf16>, vector<8x64xf32> -> vector<8x64xf32>
    %c8_41 = arith.constant 8 : index
    %c128_42 = arith.constant 128 : index
    %145 = vector.load %arg4[%c8_41, %c128_42] : memref<16x256xf32, #tpu.memory_space<vmem>>, vector<8x64xf32>
    tpu.vector_store %arg4[%c8_41, %c128_42], %144 {strides = array<i32>} : memref<16x256xf32, #tpu.memory_space<vmem>>, vector<8x64xf32>,
    %146 = vector.extract_strided_slice %5 {offsets = [8, 192], sizes = [8, 64], strides = [1, 1]} : vector<16x768xf32> to vector<8x64xf32>
    %147 = arith.truncf %146 : vector<8x64xf32> to vector<8x64xbf16>
    %148 = vector.extract_strided_slice %5 {offsets = [8, 448], sizes = [8, 64], strides = [1, 1]} : vector<16x768xf32> to vector<8x64xf32>
    %149 = arith.truncf %148 : vector<8x64xf32> to vector<8x64xbf16>
    %150 = vector.extract_strided_slice %5 {offsets = [8, 704], sizes = [8, 64], strides = [1, 1]} : vector<16x768xf32> to vector<8x64xf32>
    %151 = arith.truncf %150 : vector<8x64xf32> to vector<8x64xbf16>
    %cst_43 = arith.constant dense<0.000000e+00> : vector<8x8xf32>
    %152 = tpu.matmul %147, %149, %cst_43 {dimension_numbers = #tpu.dot_dimension_numbers<[1], [1], [0], [0], [0, 0, 1, 0], [], []>} : vector<8x64xbf16>, vector<8x64xbf16>, vector<8x8xf32> -> vector<8x8xf32>
    %cst_44 = arith.constant dense<0xFF800000> : vector<8xf32>
    %153 = vector.multi_reduction <maximumf>, %152, %cst_44 [1] : vector<8x8xf32> to vector<8xf32>
    %154 = vector.shape_cast %153 : vector<8xf32> to vector<8x1xf32>
    %155 = vector.broadcast %154 : vector<8x1xf32> to vector<8x8xf32>
    %156 = arith.subf %152, %155 : vector<8x8xf32>
    %157 = math.exp %156 : vector<8x8xf32>
    %cst_45 = arith.constant dense<0.000000e+00> : vector<8xf32>
    %158 = vector.multi_reduction <add>, %157, %cst_45 [1] : vector<8x8xf32> to vector<8xf32>
    %159 = vector.shape_cast %158 : vector<8xf32> to vector<8x1xf32>
    %160 = tpu.reciprocal %159 {approx = true} : vector<8x1xf32> -> vector<8x1xf32>
    %161 = vector.broadcast %160 : vector<8x1xf32> to vector<8x8xf32>
    %162 = arith.mulf %157, %161 : vector<8x8xf32>
    %163 = arith.truncf %162 : vector<8x8xf32> to vector<8x8xbf16>
    %cst_46 = arith.constant dense<0.000000e+00> : vector<8x64xf32>
    %164 = tpu.matmul %163, %151, %cst_46 {dimension_numbers = #tpu.dot_dimension_numbers<[1], [0], [0], [1], [0, 0, 1, 1], [], []>} : vector<8x8xbf16>, vector<8x64xbf16>, vector<8x64xf32> -> vector<8x64xf32>
    %c8_47 = arith.constant 8 : index
    %c192_48 = arith.constant 192 : index
    %165 = vector.load %arg4[%c8_47, %c192_48] : memref<16x256xf32, #tpu.memory_space<vmem>>, vector<8x64xf32>
    tpu.vector_store %arg4[%c8_47, %c192_48], %164 {strides = array<i32>} : memref<16x256xf32, #tpu.memory_space<vmem>>, vector<8x64xf32>,
    return
  }
  func.func @transform_0(%arg0: i32) -> (i32, i32) {
    %c0_i32 = arith.constant 0 : i32
    %c0_i32_0 = arith.constant 0 : i32
    return %arg0, %c0_i32 : i32, i32
  }
  func.func @transform_1(%arg0: i32) -> (i32, i32) {
    %c0_i32 = arith.constant 0 : i32
    %c0_i32_0 = arith.constant 0 : i32
    %c0_i32_1 = arith.constant 0 : i32
    return %c0_i32, %c0_i32_0 : i32, i32
  }
  func.func @transform_2(%arg0: i32) -> (i32, i32) {
    %c0_i32 = arith.constant 0 : i32
    %c0_i32_0 = arith.constant 0 : i32
    %c0_i32_1 = arith.constant 0 : i32
    return %c0_i32, %c0_i32_0 : i32, i32
  }
  func.func @transform_3(%arg0: i32) -> (i32, i32) {
    %c0_i32 = arith.constant 0 : i32
    %c0_i32_0 = arith.constant 0 : i32
    return %arg0, %c0_i32 : i32, i32
  }
}

module attributes {stable_mosaic.version = 11 : i64} {
  func.func @_residual_conv3x3x3_kernel(%arg0: i32, %arg1: memref<8x512xf32, #tpu.memory_space<vmem>>, %arg2: memref<8x512xf32, #tpu.memory_space<vmem>>, %arg3: memref<6x512xf32, #tpu.memory_space<vmem>>, %arg4: memref<8x224xf32, #tpu.memory_space<vmem>>, %arg5: memref<8x512xf32, #tpu.memory_space<vmem>>) attributes {dimension_semantics = [#tpu.dimension_semantics<parallel>], iteration_bounds = array<i64: 1>, scalar_prefetch = 0 : i64, scratch_operands = 0 : i64, tpu.core_type = #tpu.core_type<tc>, window_params = [{transform_indices = @transform_0, window_bounds = array<i64: 8, 512>}, {transform_indices = @transform_1, window_bounds = array<i64: 8, 512>}, {pipeline_mode = #tpu.pipeline_mode<synchronous>, transform_indices = @transform_2, window_bounds = array<i64: 6, 512>}, {pipeline_mode = #tpu.pipeline_mode<synchronous>, transform_indices = @transform_3, window_bounds = array<i64: 8, 224>}, {transform_indices = @transform_4, window_bounds = array<i64: 8, 512>}]} {
    %c0 = arith.constant 0 : index
    %c0_0 = arith.constant 0 : index
    %0 = vector.load %arg1[%c0, %c0_0] : memref<8x512xf32, #tpu.memory_space<vmem>>, vector<8x512xf32>
    %c0_1 = arith.constant 0 : index
    %c0_2 = arith.constant 0 : index
    %1 = vector.load %arg2[%c0_1, %c0_2] : memref<8x512xf32, #tpu.memory_space<vmem>>, vector<8x512xf32>
    %2 = arith.addf %0, %1 : vector<8x512xf32>
    %c0_3 = arith.constant 0 : index
    %c0_4 = arith.constant 0 : index
    %3 = vector.load %arg3[%c0_3, %c0_4] : memref<6x512xf32, #tpu.memory_space<vmem>>, vector<6x512xf32>
    %4 = vector.extract_strided_slice %3 {offsets = [0, 0], sizes = [1, 512], strides = [1, 1]} : vector<6x512xf32> to vector<1x512xf32>
    %5 = vector.extract_strided_slice %3 {offsets = [1, 0], sizes = [1, 512], strides = [1, 1]} : vector<6x512xf32> to vector<1x512xf32>
    %6 = vector.extract_strided_slice %3 {offsets = [2, 0], sizes = [1, 512], strides = [1, 1]} : vector<6x512xf32> to vector<1x512xf32>
    %7 = vector.extract_strided_slice %3 {offsets = [3, 0], sizes = [1, 512], strides = [1, 1]} : vector<6x512xf32> to vector<1x512xf32>
    %8 = vector.extract_strided_slice %3 {offsets = [4, 0], sizes = [1, 512], strides = [1, 1]} : vector<6x512xf32> to vector<1x512xf32>
    %9 = vector.extract_strided_slice %3 {offsets = [5, 0], sizes = [1, 512], strides = [1, 1]} : vector<6x512xf32> to vector<1x512xf32>
    %10 = vector.extract_strided_slice %2 {offsets = [0, 511], sizes = [8, 1], strides = [1, 1]} : vector<8x512xf32> to vector<8x1xf32>
    %11 = vector.extract_strided_slice %2 {offsets = [0, 0], sizes = [8, 511], strides = [1, 1]} : vector<8x512xf32> to vector<8x511xf32>
    %12 = tpu.concatenate %10, %11 in 1 : vector<8x1xf32>, vector<8x511xf32> -> vector<8x512xf32>
    %13 = vector.broadcast %4 : vector<1x512xf32> to vector<8x512xf32>
    %14 = arith.mulf %12, %13 : vector<8x512xf32>
    %15 = vector.extract_strided_slice %2 {offsets = [0, 1], sizes = [8, 511], strides = [1, 1]} : vector<8x512xf32> to vector<8x511xf32>
    %16 = vector.extract_strided_slice %2 {offsets = [0, 0], sizes = [8, 1], strides = [1, 1]} : vector<8x512xf32> to vector<8x1xf32>
    %17 = tpu.concatenate %15, %16 in 1 : vector<8x511xf32>, vector<8x1xf32> -> vector<8x512xf32>
    %18 = vector.broadcast %5 : vector<1x512xf32> to vector<8x512xf32>
    %19 = arith.mulf %17, %18 : vector<8x512xf32>
    %20 = tpu.concatenate %14, %2, %19 in 0 : vector<8x512xf32>, vector<8x512xf32>, vector<8x512xf32> -> vector<24x512xf32>
    %21 = vector.extract_strided_slice %20 {offsets = [0, 504], sizes = [24, 8], strides = [1, 1]} : vector<24x512xf32> to vector<24x8xf32>
    %22 = vector.extract_strided_slice %20 {offsets = [0, 0], sizes = [24, 504], strides = [1, 1]} : vector<24x512xf32> to vector<24x504xf32>
    %23 = tpu.concatenate %21, %22 in 1 : vector<24x8xf32>, vector<24x504xf32> -> vector<24x512xf32>
    %24 = vector.broadcast %6 : vector<1x512xf32> to vector<24x512xf32>
    %25 = arith.mulf %23, %24 : vector<24x512xf32>
    %26 = vector.extract_strided_slice %20 {offsets = [0, 8], sizes = [24, 504], strides = [1, 1]} : vector<24x512xf32> to vector<24x504xf32>
    %27 = vector.extract_strided_slice %20 {offsets = [0, 0], sizes = [24, 8], strides = [1, 1]} : vector<24x512xf32> to vector<24x8xf32>
    %28 = tpu.concatenate %26, %27 in 1 : vector<24x504xf32>, vector<24x8xf32> -> vector<24x512xf32>
    %29 = vector.broadcast %7 : vector<1x512xf32> to vector<24x512xf32>
    %30 = arith.mulf %28, %29 : vector<24x512xf32>
    %31 = tpu.concatenate %25, %20, %30 in 0 : vector<24x512xf32>, vector<24x512xf32>, vector<24x512xf32> -> vector<72x512xf32>
    %32 = vector.extract_strided_slice %31 {offsets = [0, 448], sizes = [72, 64], strides = [1, 1]} : vector<72x512xf32> to vector<72x64xf32>
    %33 = vector.extract_strided_slice %31 {offsets = [0, 0], sizes = [72, 448], strides = [1, 1]} : vector<72x512xf32> to vector<72x448xf32>
    %34 = tpu.concatenate %32, %33 in 1 : vector<72x64xf32>, vector<72x448xf32> -> vector<72x512xf32>
    %35 = vector.broadcast %8 : vector<1x512xf32> to vector<72x512xf32>
    %36 = arith.mulf %34, %35 : vector<72x512xf32>
    %37 = vector.extract_strided_slice %31 {offsets = [0, 64], sizes = [72, 448], strides = [1, 1]} : vector<72x512xf32> to vector<72x448xf32>
    %38 = vector.extract_strided_slice %31 {offsets = [0, 0], sizes = [72, 64], strides = [1, 1]} : vector<72x512xf32> to vector<72x64xf32>
    %39 = tpu.concatenate %37, %38 in 1 : vector<72x448xf32>, vector<72x64xf32> -> vector<72x512xf32>
    %40 = vector.broadcast %9 : vector<1x512xf32> to vector<72x512xf32>
    %41 = arith.mulf %39, %40 : vector<72x512xf32>
    %42 = tpu.concatenate %36, %31, %41 in 0 : vector<72x512xf32>, vector<72x512xf32>, vector<72x512xf32> -> vector<216x512xf32>
    %cst = arith.constant 1.000000e+00 : f32
    %43 = vector.broadcast %cst : f32 to vector<8x512xf32>
    %44 = tpu.concatenate %42, %43 in 0 : vector<216x512xf32>, vector<8x512xf32> -> vector<224x512xf32>
    %c0_5 = arith.constant 0 : index
    %c0_6 = arith.constant 0 : index
    %45 = vector.load %arg4[%c0_5, %c0_6] : memref<8x224xf32, #tpu.memory_space<vmem>>, vector<8x224xf32>
    %cst_7 = arith.constant dense<0.000000e+00> : vector<8x512xf32>
    %46 = tpu.matmul %45, %44, %cst_7 {dimension_numbers = #tpu.dot_dimension_numbers<[1], [0], [0], [1], [0, 0, 1, 1], [], []>} : vector<8x224xf32>, vector<224x512xf32>, vector<8x512xf32> -> vector<8x512xf32>
    %c0_8 = arith.constant 0 : index
    %c0_9 = arith.constant 0 : index
    %47 = vector.load %arg5[%c0_8, %c0_9] : memref<8x512xf32, #tpu.memory_space<vmem>>, vector<8x512xf32>
    tpu.vector_store %arg5[%c0_8, %c0_9], %46 {strides = array<i32>} : memref<8x512xf32, #tpu.memory_space<vmem>>, vector<8x512xf32>,
    return
  }
  func.func @transform_0(%arg0: i32) -> (i32, i32) {
    %c0_i32 = arith.constant 0 : i32
    %c0_i32_0 = arith.constant 0 : i32
    return %arg0, %c0_i32 : i32, i32
  }
  func.func @transform_1(%arg0: i32) -> (i32, i32) {
    %c0_i32 = arith.constant 0 : i32
    %c0_i32_0 = arith.constant 0 : i32
    return %arg0, %c0_i32 : i32, i32
  }
  func.func @transform_2(%arg0: i32) -> (i32, i32) {
    %c0_i32 = arith.constant 0 : i32
    %c0_i32_0 = arith.constant 0 : i32
    %c0_i32_1 = arith.constant 0 : i32
    return %c0_i32, %c0_i32_0 : i32, i32
  }
  func.func @transform_3(%arg0: i32) -> (i32, i32) {
    %c0_i32 = arith.constant 0 : i32
    %c0_i32_0 = arith.constant 0 : i32
    %c0_i32_1 = arith.constant 0 : i32
    return %c0_i32, %c0_i32_0 : i32, i32
  }
  func.func @transform_4(%arg0: i32) -> (i32, i32) {
    %c0_i32 = arith.constant 0 : i32
    %c0_i32_0 = arith.constant 0 : i32
    return %arg0, %c0_i32 : i32, i32
  }
}

</mosaic_0001>

<bundles_post_ra>
// kernel: tile.8
= control target key start
LH: loop header
LB: loop body
LE: loop exit
PB: predicated region body
PF: predicated region fallthrough
CT: control target
= control target key end

     0   :  { %s22_s0 = inlined_call_operand.vmem [shape: f32[4], index: 0, kind: input, shape index: {}]   ;;  %s23_s1 = inlined_call_operand.vmem [shape: f32[2,4], index: 1, kind: output, shape index: {}]  }
   0x1   :  { %v4_v0 = vld [vmem:[%s22_s0] ss:$0 sm:$0xff] }
   0x2   :  { %5 = vst [vmem:[%s23_s1] sm:$0x3] %v4_v0 }

// kernel: tile.0
= control target key start
LH: loop header
LB: loop body
LE: loop exit
PB: predicated region body
PF: predicated region fallthrough
CT: control target
= control target key end

     0   :  { %s35_s8 = smov 125   ;;  %vm8_vm0 = vcmask 7168   ;;  %s36_s11 = smov 126   ;;  %s62_s0 = inlined_call_operand.vmem [shape: f32[2,4], index: 0, kind: input, shape index: {}]   ;;  %s63_s1 = inlined_call_operand.vmem [shape: f32[8,1], index: 1, kind: output, shape index: {}]  }
   0x1   :  { %v5_v0 = vld [vmem:[%s62_s0] sm:$0x3]  ;;  %s34_s0 = smov 127  }
   0x2   :  { %6 = vst [vmem:[#allocation0] sm:$0x3] %v5_v0 }
   0x9   :  { %v10_v1 = vld [vmem:[#allocation0] sm:$0x3]  }
   0xa   :  { %v22_v2 = vld [vmem:[#allocation0] sm:$0x3]   ;;  %11 = vrot.lane.b32.xlu0 %v10_v1, %s34_s0 }
   0xb   :  { %23 = vrot.lane.b32.xlu1 %v22_v2, %s35_s8  ;;  %v7_v3 = vld [vmem:[#allocation0] sm:$0x3]  }
   0xc   :  { %v16_v4 = vld [vmem:[#allocation0] sm:$0x3]   ;;  %9 = vst.msk [vmem:[%s63_s1] ss:$4 sm:$0x3] %vm8_vm0, %v7_v3  }
   0xe   :  { %17 = vrot.lane.b32.xlu0 %v16_v4, %s36_s11 }
  0x7c   :  { %v12_v5 = vpop.permute.xlu0 %11  }
  0x7d   :  { %v24_v6 = vpop.permute.xlu1 %23   ;;  %28 = vst.msk [vmem:[%s63_s1 + $0x1] ss:$4 sm:$0x3] %vm8_vm0, %v12_v5  }
  0x7e   :  { %30 = vst.msk [vmem:[%s63_s1 + $0x3] ss:$4 sm:$0x3] %vm8_vm0, %v24_v6  }
  0x80   :  { %v18_v7 = vpop.permute.xlu0 %17  }
  0x81   :  { %29 = vst.msk [vmem:[%s63_s1 + $0x2] ss:$4 sm:$0x3] %vm8_vm0, %v18_v7  }

// kernel: transformer_block_single.2
= control target key start
LH: loop header
LB: loop body
LE: loop exit
PB: predicated region body
PF: predicated region fallthrough
CT: control target
= control target key end

     0   :  { %vm2101_vm0 = vmmov 0   ;;  %vm767_vm1 = vcmask 523264   ;;  %vm830_vm2 = vcmask 1043456   ;;  %vm814_vm3 = vcmask 64512   ;;  %s2643_s1 = inlined_call_operand.vmem [shape: bf16[256,768], index: 1, kind: input, shape index: {}]   ;;  %s2644_s0 = inlined_call_operand.vmem [shape: bf16[16,256], index: 0, kind: input, shape index: {}]   ;;  %s2645_s2 = inlined_call_operand.vmem [shape: f32[1,768], index: 2, kind: input, shape index: {}]   ;;  %s2646_s3 = inlined_call_operand.vmem [shape: f32[16,256], index: 3, kind: output, shape index: {}]  }
   0x1   :  { %v1921_v0 = vld [vmem:[%s2643_s1 + $0x15c] ss:$24 sps:$4 sm:$0xff]   ;;  %v1923_v1 = vld [vmem:[%s2643_s1 + $0x158] ss:$24 sps:$4 sm:$0xff]   ;;  %v1927_v4 = vld [vmem:[%s2643_s1 + $0x12c] ss:$24 sps:$4 sm:$0xff]  }
   0x2   :  { %678 = vmatprep.subr.bf16.mxu1 %v1921_v0  ;;  %v1924_v2 = vld [vmem:[%s2643_s1 + $0x154] ss:$24 sps:$4 sm:$0xff]   ;;  %v1926_v3 = vld [vmem:[%s2643_s1 + $0x150] ss:$24 sps:$4 sm:$0xff]   ;;  %v1930_v6 = vld [vmem:[%s2643_s1 + $0x124] ss:$24 sps:$4 sm:$0xff]  }
   0x3   :  { %679 = vmatpush1.bf16.msra.mxu1 %v1923_v1  ;;  %v1929_v5 = vld [vmem:[%s2643_s1 + $0x128] ss:$24 sps:$4 sm:$0xff]   ;;  %635 = vmatprep.subr.bf16.mxu0 %v1924_v2  ;;  %v1933_v8 = vld [vmem:[%s2643_s1 + $0xfc] ss:$24 sps:$4 sm:$0xff]   ;;  %v1935_v9 = vld [vmem:[%s2643_s1 + $0xf8] ss:$24 sps:$4 sm:$0xff]  }
   0x4   :  { %636 = vmatpush1.bf16.msra.mxu0 %v1926_v3  ;;  %680 = vmatprep.subr.bf16.mxu1 %v1927_v4  ;;  %v1932_v7 = vld [vmem:[%s2643_s1 + $0x120] ss:$24 sps:$4 sm:$0xff]   ;;  %v1936_v10 = vld [vmem:[%s2643_s1 + $0xf4] ss:$24 sps:$4 sm:$0xff]   ;;  %v1938_v12 = vld [vmem:[%s2643_s1 + $0xf0] ss:$24 sps:$4 sm:$0xff]  }
   0x5   :  { %637 = vmatprep.subr.bf16.mxu0 %v1930_v6  ;;  %v1939_v11 = vld [vmem:[%s2643_s1 + $0xcc] ss:$24 sps:$4 sm:$0xff]   ;;  %v1941_v14 = vld [vmem:[%s2643_s1 + $0xc8] ss:$24 sps:$4 sm:$0xff]   ;;  %v1945_v15 = vld [vmem:[%s2643_s1 + $0x9c] ss:$24 sps:$4 sm:$0xff]  }
   0x6   :  { %v1942_v13 = vld [vmem:[%s2643_s1 + $0xc4] ss:$24 sps:$4 sm:$0xff]   ;;  %v1944_v16 = vld [vmem:[%s2643_s1 + $0xc0] ss:$24 sps:$4 sm:$0xff]   ;;  %v1948_v17 = vld [vmem:[%s2643_s1 + $0x94] ss:$24 sps:$4 sm:$0xff]  }
   0x7   :  { %681 = vmatpush1.bf16.msra.mxu1 %v1929_v5  ;;  %v1947_v18 = vld [vmem:[%s2643_s1 + $0x98] ss:$24 sps:$4 sm:$0xff]   ;;  %v1951_v19 = vld [vmem:[%s2643_s1 + $0x6c] ss:$24 sps:$4 sm:$0xff]   ;;  %v1953_v22 = vld [vmem:[%s2643_s1 + $0x68] ss:$24 sps:$4 sm:$0xff]  }
   0x8   :  { %682 = vmatprep.subr.bf16.mxu1 %v1933_v8  ;;  %638 = vmatpush1.bf16.msra.mxu0 %v1932_v7  ;;  %v1950_v20 = vld [vmem:[%s2643_s1 + $0x90] ss:$24 sps:$4 sm:$0xff]   ;;  %v1954_v21 = vld [vmem:[%s2643_s1 + $0x64] ss:$24 sps:$4 sm:$0xff]   ;;  %v1956_v24 = vld [vmem:[%s2643_s1 + $0x60] ss:$24 sps:$4 sm:$0xff]  }
   0x9   :  { %639 = vmatprep.subr.bf16.mxu0 %v1936_v10  ;;  %v1957_v23 = vld [vmem:[%s2643_s1 + $0x3c] ss:$24 sps:$4 sm:$0xff]   ;;  %v1959_v26 = vld [vmem:[%s2643_s1 + $0x38] ss:$24 sps:$4 sm:$0xff]   ;;  %v1963_v27 = vld [vmem:[%s2643_s1 + $0xc] ss:$24 sps:$4 sm:$0xff]  }
   0xa   :  { %v1960_v25 = vld [vmem:[%s2643_s1 + $0x34] ss:$24 sps:$4 sm:$0xff]   ;;  %v1962_v28 = vld [vmem:[%s2643_s1 + $0x30] ss:$24 sps:$4 sm:$0xff]   ;;  %v1966_v29 = vld [vmem:[%s2643_s1 + $0x4] ss:$24 sps:$4 sm:$0xff]  }
   0xb   :  { %683 = vmatpush1.bf16.msra.mxu1 %v1935_v9  ;;  %v1965_v30 = vld [vmem:[%s2643_s1 + $0x8] ss:$24 sps:$4 sm:$0xff]   ;;  %v1969_v31 = vld [vmem:[%s2643_s1 + $0x2dc] ss:$24 sps:$4 sm:$0xff]   ;;  %v1971_v34 = vld [vmem:[%s2643_s1 + $0x2d8] ss:$24 sps:$4 sm:$0xff]  }
   0xc   :  { %684 = vmatprep.subr.bf16.mxu1 %v1939_v11  ;;  %640 = vmatpush1.bf16.msra.mxu0 %v1938_v12  ;;  %v1968_v32 = vld [vmem:[%s2643_s1] ss:$24 sps:$4 sm:$0xff]   ;;  %v1972_v33 = vld [vmem:[%s2643_s1 + $0x2d4] ss:$24 sps:$4 sm:$0xff]   ;;  %v1974_v36 = vld [vmem:[%s2643_s1 + $0x2d0] ss:$24 sps:$4 sm:$0xff]  }
   0xd   :  { %641 = vmatprep.subr.bf16.mxu0 %v1942_v13  ;;  %v1975_v35 = vld [vmem:[%s2643_s1 + $0x2ac] ss:$24 sps:$4 sm:$0xff]   ;;  %v1977_v38 = vld [vmem:[%s2643_s1 + $0x2a8] ss:$24 sps:$4 sm:$0xff]   ;;  %v1981_v39 = vld [vmem:[%s2643_s1 + $0x27c] ss:$24 sps:$4 sm:$0xff]  }
   0xe   :  { %v1978_v37 = vld [vmem:[%s2643_s1 + $0x2a4] ss:$24 sps:$4 sm:$0xff]   ;;  %v1980_v40 = vld [vmem:[%s2643_s1 + $0x2a0] ss:$24 sps:$4 sm:$0xff]   ;;  %v1984_v41 = vld [vmem:[%s2643_s1 + $0x274] ss:$24 sps:$4 sm:$0xff]  }
   0xf   :  { %685 = vmatpush1.bf16.msra.mxu1 %v1941_v14  ;;  %v1983_v42 = vld [vmem:[%s2643_s1 + $0x278] ss:$24 sps:$4 sm:$0xff]   ;;  %v1987_v43 = vld [vmem:[%s2643_s1 + $0x24c] ss:$24 sps:$4 sm:$0xff]   ;;  %v1989_v46 = vld [vmem:[%s2643_s1 + $0x248] ss:$24 sps:$4 sm:$0xff]  }
  0x10   :  { %686 = vmatprep.subr.bf16.mxu1 %v1945_v15  ;;  %642 = vmatpush1.bf16.msra.mxu0 %v1944_v16  ;;  %v1986_v44 = vld [vmem:[%s2643_s1 + $0x270] ss:$24 sps:$4 sm:$0xff]   ;;  %v1990_v45 = vld [vmem:[%s2643_s1 + $0x244] ss:$24 sps:$4 sm:$0xff]   ;;  %v1992_v49 = vld [vmem:[%s2643_s1 + $0x240] ss:$24 sps:$4 sm:$0xff]  }
  0x11   :  { %643 = vmatprep.subr.bf16.mxu0 %v1948_v17  ;;  %v2016_v47 = vld [vmem:[%s2644_s0 + $0x4] ss:$8 sps:$4 sm:$0xff]   ;;  %v1993_v48 = vld [vmem:[%s2643_s1 + $0x21c] ss:$24 sps:$4 sm:$0xff]   ;;  %v1995_v51 = vld [vmem:[%s2643_s1 + $0x218] ss:$24 sps:$4 sm:$0xff]  }
  0x12   :  { %710 = vmatprep.mubr.bf16.mxu1 %v2016_v47  ;;  %v1996_v50 = vld [vmem:[%s2643_s1 + $0x214] ss:$24 sps:$4 sm:$0xff]   ;;  %667 = vmatprep.mubr.bf16.mxu0 %v2016_v47  ;;  %v1998_v53 = vld [vmem:[%s2643_s1 + $0x210] ss:$24 sps:$4 sm:$0xff]   ;;  %v2002_v54 = vld [vmem:[%s2643_s1 + $0x1e4] ss:$24 sps:$4 sm:$0xff]  }
  0x13   :  { %687 = vmatpush1.bf16.msra.mxu1 %v1947_v18  ;;  %v1999_v52 = vld [vmem:[%s2643_s1 + $0x1ec] ss:$24 sps:$4 sm:$0xff]   ;;  %v2001_v55 = vld [vmem:[%s2643_s1 + $0x1e8] ss:$24 sps:$4 sm:$0xff]   ;;  %v2005_v56 = vld [vmem:[%s2643_s1 + $0x1bc] ss:$24 sps:$4 sm:$0xff]  }
  0x14   :  { %688 = vmatprep.subr.bf16.mxu1 %v1951_v19  ;;  %644 = vmatpush1.bf16.msra.mxu0 %v1950_v20  ;;  %v2004_v57 = vld [vmem:[%s2643_s1 + $0x1e0] ss:$24 sps:$4 sm:$0xff]   ;;  %v2008_v58 = vld [vmem:[%s2643_s1 + $0x1b4] ss:$24 sps:$4 sm:$0xff]   ;;  %v2010_v61 = vld [vmem:[%s2643_s1 + $0x1b0] ss:$24 sps:$4 sm:$0xff]  }
  0x15   :  { %645 = vmatprep.subr.bf16.mxu0 %v1954_v21  ;;  %v2007_v59 = vld [vmem:[%s2643_s1 + $0x1b8] ss:$24 sps:$4 sm:$0xff]   ;;  %v2011_v60 = vld [vmem:[%s2643_s1 + $0x18c] ss:$24 sps:$4 sm:$0xff]   ;;  %v2013_v63 = vld [vmem:[%s2643_s1 + $0x188] ss:$24 sps:$4 sm:$0xff]  }
  0x16   :  { %v2014_v62 = vld [vmem:[%s2643_s1 + $0x184] ss:$24 sps:$4 sm:$0xff]   ;;  %v2018_v0 = vld [vmem:[%s2643_s1 + $0x180] ss:$24 sps:$4 sm:$0xff]   ;;  %v2025_v4 = vld [vmem:[%s2643_s1 + $0x134] ss:$24 sps:$4 sm:$0xff]  }
  0x17   :  { %689 = vmatpush1.bf16.msra.mxu1 %v1953_v22  ;;  %v2321_v1 = vld [vmem:[%s2644_s0] ss:$8 sps:$4 sm:$0xff]   ;;  %v2022_v2 = vld [vmem:[%s2643_s1 + $0x164] ss:$24 sps:$4 sm:$0xff]   ;;  %v2031_v8 = vld [vmem:[%s2643_s1 + $0xd4] ss:$24 sps:$4 sm:$0xff]  }
  0x18   :  { %690 = vmatprep.subr.bf16.mxu1 %v1957_v23  ;;  %646 = vmatpush1.bf16.msra.mxu0 %v1956_v24  ;;  %v2020_v3 = vld [vmem:[%s2643_s1 + $0x160] ss:$24 sps:$4 sm:$0xff]   ;;  %v2023_v5 = vld [vmem:[%s2643_s1 + $0x130] ss:$24 sps:$4 sm:$0xff]   ;;  %v2028_v6 = vld [vmem:[%s2643_s1 + $0x104] ss:$24 sps:$4 sm:$0xff]  }
  0x19   :  { %647 = vmatprep.subr.bf16.mxu0 %v1960_v25  ;;  %v2026_v7 = vld [vmem:[%s2643_s1 + $0x100] ss:$24 sps:$4 sm:$0xff]   ;;  %v2029_v9 = vld [vmem:[%s2643_s1 + $0xd0] ss:$24 sps:$4 sm:$0xff]   ;;  %v2034_v10 = vld [vmem:[%s2643_s1 + $0xa4] ss:$24 sps:$4 sm:$0xff]  }
  0x1a   :  { %v2032_v11 = vld [vmem:[%s2643_s1 + $0xa0] ss:$24 sps:$4 sm:$0xff]   ;;  %v2037_v12 = vld [vmem:[%s2643_s1 + $0x74] ss:$24 sps:$4 sm:$0xff]   ;;  %v2035_v13 = vld [vmem:[%s2643_s1 + $0x70] ss:$24 sps:$4 sm:$0xff]  }
  0x1b   :  { %691 = vmatpush1.bf16.msra.mxu1 %v1959_v26  ;;  %v2040_v14 = vld [vmem:[%s2643_s1 + $0x44] ss:$24 sps:$4 sm:$0xff]   ;;  %v2038_v15 = vld [vmem:[%s2643_s1 + $0x40] ss:$24 sps:$4 sm:$0xff]   ;;  %v2043_v16 = vld [vmem:[%s2643_s1 + $0x14] ss:$24 sps:$4 sm:$0xff]  }
  0x1c   :  { %692 = vmatprep.subr.bf16.mxu1 %v1963_v27  ;;  %648 = vmatpush1.bf16.msra.mxu0 %v1962_v28  ;;  %v2041_v17 = vld [vmem:[%s2643_s1 + $0x10] ss:$24 sps:$4 sm:$0xff]   ;;  %v2046_v18 = vld [vmem:[%s2643_s1 + $0x2e4] ss:$24 sps:$4 sm:$0xff]   ;;  %v2044_v19 = vld [vmem:[%s2643_s1 + $0x2e0] ss:$24 sps:$4 sm:$0xff]  }
  0x1d   :  { %649 = vmatprep.subr.bf16.mxu0 %v1966_v29  ;;  %v2049_v20 = vld [vmem:[%s2643_s1 + $0x2b4] ss:$24 sps:$4 sm:$0xff]   ;;  %v2047_v21 = vld [vmem:[%s2643_s1 + $0x2b0] ss:$24 sps:$4 sm:$0xff]   ;;  %v2052_v22 = vld [vmem:[%s2643_s1 + $0x284] ss:$24 sps:$4 sm:$0xff]  }
  0x1e   :  { %v2050_v23 = vld [vmem:[%s2643_s1 + $0x280] ss:$24 sps:$4 sm:$0xff]   ;;  %v2055_v24 = vld [vmem:[%s2643_s1 + $0x254] ss:$24 sps:$4 sm:$0xff]   ;;  %v2053_v25 = vld [vmem:[%s2643_s1 + $0x250] ss:$24 sps:$4 sm:$0xff]  }
  0x1f   :  { %693 = vmatpush1.bf16.msra.mxu1 %v1965_v30  ;;  %v2058_v26 = vld [vmem:[%s2643_s1 + $0x224] ss:$24 sps:$4 sm:$0xff]   ;;  %v2056_v27 = vld [vmem:[%s2643_s1 + $0x220] ss:$24 sps:$4 sm:$0xff]   ;;  %v2061_v28 = vld [vmem:[%s2643_s1 + $0x1f4] ss:$24 sps:$4 sm:$0xff]  }
  0x20   :  { %694 = vmatprep.subr.bf16.mxu1 %v1969_v31  ;;  %650 = vmatpush1.bf16.msra.mxu0 %v1968_v32  ;;  %v2059_v29 = vld [vmem:[%s2643_s1 + $0x1f0] ss:$24 sps:$4 sm:$0xff]   ;;  %v2064_v30 = vld [vmem:[%s2643_s1 + $0x1c4] ss:$24 sps:$4 sm:$0xff]   ;;  %v2062_v31 = vld [vmem:[%s2643_s1 + $0x1c0] ss:$24 sps:$4 sm:$0xff]  }
  0x21   :  { %651 = vmatprep.subr.bf16.mxu0 %v1972_v33  ;;  %v2067_v32 = vld [vmem:[%s2643_s1 + $0x194] ss:$24 sps:$4 sm:$0xff]   ;;  %v2065_v33 = vld [vmem:[%s2643_s1 + $0x190] ss:$24 sps:$4 sm:$0xff]   ;;  %vm992_vm4 = vcmask 1048064  }
  0x23   :  { %695 = vmatpush2.bf16.msra.mxu1 %v1971_v34  ;;  %v2100_v34 = vmov 0.0  }
  0x24   :  { %696 = vmatprep.subr.bf16.mxu1 %v1975_v35  ;;  %652 = vmatpush2.bf16.msra.mxu0 %v1974_v36  ;;  %v115_v35 = vlaneseq }
  0x25   :  { %653 = vmatprep.subr.bf16.mxu0 %v1978_v37 }
  0x26   :  { %v2428_v36 = vshrl.u32 %v115_v35, 7 }
  0x27   :  { %697 = vmatpush2.bf16.msra.mxu1 %v1977_v38  ;;  %v2434_v38 = vld [vmem:[%s2645_s2] sm:$0x3f]  ;;  %s2102_s2 = smov 64  }
  0x28   :  { %698 = vmatprep.subr.bf16.mxu1 %v1981_v39  ;;  %654 = vmatpush2.bf16.msra.mxu0 %v1980_v40  ;;  %v125_v37 = vsub.s32 2, %v2428_v36  ;;  %v117_v39 = vsub.s32 0, %v2428_v36 }
  0x29   :  { %655 = vmatprep.subr.bf16.mxu0 %v1984_v41 }
  0x2a   :  { %v126_v40 = vrot.slane %v2434_v38, %v125_v37  ;;  %v118_v41 = vrot.slane %v2434_v38, %v117_v39 }
  0x2b   :  { %699 = vmatpush2.bf16.msra.mxu1 %v1983_v42 }
  0x2c   :  { %700 = vmatprep.subr.bf16.mxu1 %v1987_v43  ;;  %656 = vmatpush2.bf16.msra.mxu0 %v1986_v44  ;;  %v121_v44 = vsub.s32 1, %v2428_v36 }
  0x2d   :  { %657 = vmatprep.subr.bf16.mxu0 %v1990_v45 }
  0x2f   :  { %701 = vmatpush2.bf16.msra.mxu1 %v1989_v46 }
  0x30   :  { %702 = vmatprep.subr.bf16.mxu1 %v1993_v48  ;;  %658 = vmatpush2.bf16.msra.mxu0 %v1992_v49 }
  0x31   :  { %659 = vmatprep.subr.bf16.mxu0 %v1996_v50 }
  0x33   :  { %703 = vmatpush2.bf16.msra.mxu1 %v1995_v51 }
  0x34   :  { %704 = vmatprep.subr.bf16.mxu1 %v1999_v52  ;;  %660 = vmatpush2.bf16.msra.mxu0 %v1998_v53 }
  0x35   :  { %661 = vmatprep.subr.bf16.mxu0 %v2002_v54  ;;  %v2447_v54 = vrot.slane %v2434_v38, %v121_v44 }
  0x37   :  { %705 = vmatpush2.bf16.msra.mxu1 %v2001_v55 }
  0x38   :  { %706 = vmatprep.subr.bf16.mxu1 %v2005_v56  ;;  %662 = vmatpush2.bf16.msra.mxu0 %v2004_v57 }
  0x39   :  { %663 = vmatprep.subr.bf16.mxu0 %v2008_v58 }
  0x3b   :  { %707 = vmatpush2.bf16.msra.mxu1 %v2007_v59 }
  0x3c   :  { %708 = vmatprep.subr.bf16.mxu1 %v2011_v60  ;;  %664 = vmatpush2.bf16.msra.mxu0 %v2010_v61 }
  0x3d   :  { %665 = vmatprep.subr.bf16.mxu0 %v2014_v62  ;;  %v133_v62 = vsub.s32 4, %v2428_v36 }
  0x3f   :  { %709 = vmatpush2.bf16.msra.mxu1 %v2013_v63  ;;  %v134_v63 = vrot.slane %v2434_v38, %v133_v62 }
  0x40   :  { %666 = vmatpush2.bf16.msra.mxu0 %v2018_v0  ;;  %1822 = vmatprep.subr.bf16.mxu1 %v2100_v34 }
  0x41   :  { %721 = vmatprep.subr.bf16.mxu0 %v2022_v2 }
  0x42   :  { %711 = vmatmul.mubr.bf16.vlgmr.msra.gmra.mxu1 %v2321_v1 }
  0x43   :  { %668 = vmatmul.mubr.bf16.vlgmr.msra.gmra.mxu0 %v2321_v1  ;;  %1824 = vmatprep.mubr.msk.bf16.mxu1 %vm2101_vm0, %v2100_v34 }
  0x44   :  { %722 = vmatpush1.bf16.msra.mxu0 %v2020_v3  ;;  %753 = vmatprep.mubr.bf16.mxu0 %v2016_v47 }
  0x45   :  { %723 = vmatprep.subr.bf16.mxu0 %v2025_v4 }
  0x48   :  { %724 = vmatpush1.bf16.msra.mxu0 %v2023_v5 }
  0x49   :  { %725 = vmatprep.subr.bf16.mxu0 %v2028_v6 }
  0x4c   :  { %726 = vmatpush1.bf16.msra.mxu0 %v2026_v7 }
  0x4d   :  { %727 = vmatprep.subr.bf16.mxu0 %v2031_v8 }
  0x50   :  { %728 = vmatpush1.bf16.msra.mxu0 %v2029_v9 }
  0x51   :  { %729 = vmatprep.subr.bf16.mxu0 %v2034_v10 }
  0x54   :  { %730 = vmatpush1.bf16.msra.mxu0 %v2032_v11 }
  0x55   :  { %731 = vmatprep.subr.bf16.mxu0 %v2037_v12 }
  0x58   :  { %732 = vmatpush1.bf16.msra.mxu0 %v2035_v13 }
  0x59   :  { %733 = vmatprep.subr.bf16.mxu0 %v2040_v14 }
  0x5c   :  { %734 = vmatpush1.bf16.msra.mxu0 %v2038_v15 }
  0x5d   :  { %735 = vmatprep.subr.bf16.mxu0 %v2043_v16 }
  0x60   :  { %736 = vmatpush1.bf16.msra.mxu0 %v2041_v17 }
  0x61   :  { %737 = vmatprep.subr.bf16.mxu0 %v2046_v18 }
  0x64   :  { %738 = vmatpush2.bf16.msra.mxu0 %v2044_v19 }
  0x65   :  { %739 = vmatprep.subr.bf16.mxu0 %v2049_v20 }
  0x68   :  { %740 = vmatpush2.bf16.msra.mxu0 %v2047_v21 }
  0x69   :  { %741 = vmatprep.subr.bf16.mxu0 %v2052_v22 }
  0x6c   :  { %742 = vmatpush2.bf16.msra.mxu0 %v2050_v23 }
  0x6d   :  { %743 = vmatprep.subr.bf16.mxu0 %v2055_v24 }
  0x70   :  { %744 = vmatpush2.bf16.msra.mxu0 %v2053_v25 }
  0x71   :  { %745 = vmatprep.subr.bf16.mxu0 %v2058_v26 }
  0x74   :  { %746 = vmatpush2.bf16.msra.mxu0 %v2056_v27 }
  0x75   :  { %747 = vmatprep.subr.bf16.mxu0 %v2061_v28 }
  0x78   :  { %748 = vmatpush2.bf16.msra.mxu0 %v2059_v29 }
  0x79   :  { %749 = vmatprep.subr.bf16.mxu0 %v2064_v30 }
  0x7c   :  { %750 = vmatpush2.bf16.msra.mxu0 %v2062_v31 }
  0x7d   :  { %751 = vmatprep.subr.bf16.mxu0 %v2067_v32 }
  0x80   :  { %752 = vmatpush2.bf16.msra.mxu0 %v2065_v33 }
  0x81   :  { %1870 = vmatprep.subr.bf16.mxu0 %v2100_v34 }
  0x83   :  { %754 = vmatmul.mubr.bf16.vlgmr.msra.gmra.mxu0 %v2321_v1 }
  0x84   :  { %1872 = vmatprep.mubr.msk.bf16.mxu0 %vm2101_vm0, %v2100_v34 }
 0x102   :  { %v712_v42 = vpop.f32.mrf.mxu1 }
 0x103   :  { %v713_v43 = vadd.f32 %v712_v42, %v126_v40  ;;  %v669_v46 = vpop.f32.mrf.mxu0 }
 0x104   :  { %v2440_v45 = vpop.f32.mrf.mxu1  ;;  %v670_v48 = vadd.f32 %v669_v46, %v118_v41 }
 0x105   :  { %v765_v47 = vpack.c.bf16 %v713_v43, %v713_v43  ;;  %v2442_v50 = vpop.f32.mrf.mxu0 }
 0x106   :  { %v716_v49 = vpop.f32.mrf.mxu1  ;;  %v764_v52 = vpack.c.bf16 %v670_v48, %v670_v48 }
 0x107   :  { %v772_v51 = vsel %vm767_vm1, %v765_v47, 0  ;;  %v717_v53 = vadd.f32 %v716_v49, %v126_v40  ;;  %879 = vrot.lane.b32.xlu1 %v765_v47, %s2102_s2  ;;  %v673_v55 = vpop.f32.mrf.mxu0 }
 0x108   :  { %1823 = vmatpush3.bf16.xpose.msra.mxu1 %v772_v51  ;;  %v674_v60 = vadd.f32 %v673_v55, %v118_v41  ;;  %v2476_v7 = vpop.f32.mrf.mxu1 }
 0x109   :  { %v2449_v56 = vpack.c.bf16 %v717_v53, %v717_v53  ;;  %1828 = vmatprep.subr.bf16.mxu1 %v2100_v34  ;;  %v675_v57 = vpop.f32.mrf.mxu0 }
 0x10a   :  { %v2455_v59 = vadd.f32 %v675_v57, %v2447_v54  ;;  %v2462_v61 = vpack.c.bf16 %v674_v60, %v674_v60  ;;  %v137_v57 = vsub.s32 5, %v2428_v36 }
 0x10b   :  { %v1227_v58 = vsel %vm767_vm1, %v2449_v56, 0  ;;  %876 = vrot.lane.b32.xlu1 %v764_v52, %s2102_s2 }
 0x10c   :  { %1871 = vmatpush3.bf16.xpose.msra.mxu0 %v1227_v58  ;;  %v2506_v62 = vrot.slane %v2434_v38, %v137_v57 }
 0x10d   :  { %1882 = vmatprep.subr.bf16.mxu0 %v2100_v34 }
 0x10f   :  { %1825 = vmatmul.mubr.msk.bf16.vlgmr.msra.gmra.mxu1 %vm767_vm1, %v764_v52  ;;  %v129_v52 = vsub.s32 3, %v2428_v36  ;;  %v672_v36 = vadd.f32 %v2442_v50, %v2447_v54 }
 0x110   :  { %1830 = vmatprep.mubr.msk.bf16.mxu1 %vm2101_vm0, %v2100_v34 }
 0x111   :  { %v130_v53 = vrot.slane %v2434_v38, %v129_v52 }
 0x113   :  { %1873 = vmatmul.mubr.msk.bf16.vlgmr.msra.gmra.mxu0 %vm767_vm1, %v2462_v61  ;;  %v715_v55 = vadd.f32 %v2440_v45, %v130_v53  ;;  %v994_v45 = vpack.c.bf16 %v672_v36, %v672_v36 }
 0x114   :  { %1884 = vmatprep.mubr.msk.bf16.mxu0 %vm2101_vm0, %v2100_v34 }
 0x115   :  { %v995_v60 = vpack.c.bf16 %v715_v55, %v715_v55 }
 0x143   :  { %v755_v0 = vpop.f32.mrf.mxu0 }
 0x144   :  { %v756_v1 = vadd.f32 %v755_v0, %v134_v63 }
 0x145   :  { %v2470_v2 = vpop.f32.mrf.mxu0 }
 0x146   :  { %v766_v3 = vpack.c.bf16 %v756_v1, %v756_v1  ;;  %v1001_v1 = vsel %vm767_vm1, %v995_v60, 0 }
 0x147   :  { %v759_v4 = vpop.f32.mrf.mxu0 }
 0x148   :  { %v832_v5 = vsel %vm830_vm2, %v766_v3, 0  ;;  %v2473_v6 = vadd.f32 %v759_v4, %v134_v63 }
 0x149   :  { %1829 = vmatpush3.bf16.msra.mxu1 %v832_v5  ;;  %v2478_v9 = vpop.f32.mrf.mxu0 }
 0x14a   :  { %1834 = vmatprep.subr.bf16.mxu1 %v2100_v34 }
 0x179   :  { %v880_v26 = vpop.permute.xlu1 %879 }
 0x17a   :  { %v885_v28 = vsel %vm767_vm1, %v880_v26, 0 }
 0x17d   :  { %v877_v29 = vpop.permute.xlu1 %876 }
 0x1cf   :  { %v808_v8 = vpop.f32.mrf.mxu1 }
 0x1d0   :  { %v815_v10 = vsel %vm814_vm3, %v808_v8, -inf }
 0x1d1   :  { %816 = vmax.xlane.f32.xlu0 %v815_v10  ;;  %v1826_v11 = vpop.f32.mrf.mxu1 }
 0x1d3   :  { %v811_v12 = vpop.f32.mrf.mxu1  ;;  %v2481_v13 = vpop.f32.mrf.mxu0 }
 0x1d5   :  { %v1827_v14 = vpop.f32.mrf.mxu1  ;;  %v1874_v15 = vpop.f32.mrf.mxu0 }
 0x1d6   :  { %v1269_v15 = vsel %vm814_vm3, %v2481_v13, -inf }
 0x1d7   :  { %v1266_v16 = vpop.f32.mrf.mxu0 }
 0x1d9   :  { %v1875_v17 = vpop.f32.mrf.mxu0 }
 0x25a   :  { %v817_v18 = vpop.xlane.xlu0 %816 }
 0x25b   :  { %v818_v19 = vsub.f32 %v808_v8, %v817_v18 }
 0x25d   :  { %v819_v20 = vmul.f32 1.442695, %v818_v19 }
 0x25f   :  { %2068 = vpow2.f32 %v819_v20 }
 0x26c   :  { %v2069_v21 = vpop.eup %2068 }
 0x26d   :  { %v821_v22 = vsel %vm814_vm3, %v2069_v21, 0.0 }
 0x26e   :  { %822 = vadd.xlane.f32.xlu0 %v821_v22 }
 0x2f7   :  { %v823_v23 = vpop.xlane.xlu0 %822 }
 0x2f8   :  { %2070 = vrcp.f32 %v823_v23  ;;  %v1446_v23 = vpack.c.bf16 %v2455_v59, %v2455_v59 }
 0x305   :  { %v2071_v24 = vpop.eup %2070 }
 0x306   :  { %v825_v25 = vmul.f32 %v2071_v24, %v2069_v21  ;;  %v719_v21 = vadd.f32 %v2476_v7, %v130_v53 }
 0x308   :  { %v826_v27 = vpack.c.bf16 %v825_v25, %v825_v25  ;;  %v1447_v22 = vpack.c.bf16 %v719_v21, %v719_v21 }
 0x30a   :  { %1831 = vmatmul.mubr.msk.bf16.vlgmr.msra.gmra.mxu1 %vm814_vm3, %v826_v27 }
 0x30b   :  { %1835 = vmatpush3.bf16.xpose.msra.mxu1 %v885_v28  ;;  %1836 = vmatprep.mubr.msk.bf16.mxu1 %vm2101_vm0, %v2100_v34  ;;  %v1453_v28 = vsel %vm767_vm1, %v1447_v22, 0 }
 0x30c   :  { %1840 = vmatprep.subr.bf16.mxu1 %v2100_v34 }
 0x312   :  { %1837 = vmatmul.mubr.msk.bf16.vlgmr.msra.gmra.mxu1 %vm767_vm1, %v877_v29 }
 0x313   :  { %1842 = vmatprep.mubr.msk.bf16.mxu1 %vm2101_vm0, %v2100_v34 }
 0x3ca   :  { %v868_v30 = vpop.f32.mrf.mxu1 }
 0x3cb   :  { %874 = vst.msk [vmem:[%s2646_s3] sm:$0xff] %vm767_vm1, %v868_v30 }
 0x3cc   :  { %v1832_v31 = vpop.f32.mrf.mxu1 }
 0x3ce   :  { %v871_v32 = vpop.f32.mrf.mxu1 }
 0x3d0   :  { %v1833_v33 = vpop.f32.mrf.mxu1 }
 0x3d2   :  { %v921_v35 = vpop.f32.mrf.mxu1 }
 0x3d3   :  { %v927_v37 = vsel %vm814_vm3, %v921_v35, -inf }
 0x3d4   :  { %928 = vmax.xlane.f32.xlu0 %v927_v37  ;;  %v1838_v39 = vpop.f32.mrf.mxu1 }
 0x3d6   :  { %v924_v40 = vpop.f32.mrf.mxu1 }
 0x3d8   :  { %v1839_v41 = vpop.f32.mrf.mxu1 }
 0x3ea   :  { %940 = vrot.lane.b32.xlu0 %v766_v3, %s2102_s2  ;;  %v758_v3 = vadd.f32 %v2470_v2, %v2506_v62 }
 0x3ec   :  { %v2517_v38 = vpack.c.bf16 %v758_v3, %v758_v3 }
 0x3ee   :  { %v1059_v4 = vsel %vm830_vm2, %v2517_v38, 0 }
 0x45d   :  { %v929_v42 = vpop.xlane.xlu0 %928 }
 0x45e   :  { %v930_v43 = vsub.f32 %v921_v35, %v929_v42 }
 0x460   :  { %v931_v44 = vmul.f32 1.442695, %v930_v43 }
 0x461   :  { %v941_v46 = vpop.permute.xlu0 %940 }
 0x462   :  { %2072 = vpow2.f32 %v931_v44  ;;  %v946_v47 = vsel %vm830_vm2, %v941_v46, 0 }
 0x463   :  { %1841 = vmatpush3.bf16.msra.mxu1 %v946_v47 }
 0x464   :  { %1846 = vmatprep.subr.bf16.mxu1 %v2100_v34 }
 0x46f   :  { %v2073_v48 = vpop.eup %2072 }
 0x470   :  { %v933_v49 = vsel %vm814_vm3, %v2073_v48, 0.0 }
 0x471   :  { %934 = vadd.xlane.f32.xlu1 %v933_v49 }
 0x4fa   :  { %v935_v51 = vpop.xlane.xlu1 %934 }
 0x4fb   :  { %2074 = vrcp.f32 %v935_v51 }
 0x508   :  { %v2075_v58 = vpop.eup %2074 }
 0x509   :  { %v937_v63 = vmul.f32 %v2075_v58, %v2073_v48 }
 0x50b   :  { %v938_v0 = vpack.c.bf16 %v937_v63, %v937_v63 }
 0x50d   :  { %1843 = vmatmul.mubr.msk.bf16.vlgmr.msra.gmra.mxu1 %vm814_vm3, %v938_v0 }
 0x50e   :  { %1847 = vmatpush3.bf16.xpose.msra.mxu1 %v1001_v1  ;;  %1848 = vmatprep.mubr.msk.bf16.mxu1 %vm2101_vm0, %v2100_v34 }
 0x50f   :  { %1852 = vmatprep.subr.bf16.mxu1 %v2100_v34 }
 0x515   :  { %1849 = vmatmul.mubr.msk.bf16.vlgmr.msra.gmra.mxu1 %vm767_vm1, %v994_v45 }
 0x516   :  { %1853 = vmatpush3.bf16.msra.mxu1 %v1059_v4  ;;  %1854 = vmatprep.mubr.msk.bf16.mxu1 %vm2101_vm0, %v2100_v34 }
 0x517   :  { %1858 = vmatprep.subr.bf16.mxu1 %v2100_v34 }
 0x5cd   :  { %v2525_v2 = vpop.f32.mrf.mxu1 }
 0x5cf   :  { %v1844_v5 = vpop.f32.mrf.mxu1 }
 0x5d1   :  { %v985_v50 = vpop.f32.mrf.mxu1 }
 0x5d3   :  { %v1845_v54 = vpop.f32.mrf.mxu1 }
 0x5d5   :  { %v1037_v8 = vpop.f32.mrf.mxu1 }
 0x5d6   :  { %v1043_v10 = vsel %vm814_vm3, %v1037_v8, -inf }
 0x5d7   :  { %1044 = vmax.xlane.f32.xlu0 %v1043_v10  ;;  %v1850_v11 = vpop.f32.mrf.mxu1 }
 0x5d9   :  { %v1040_v12 = vpop.f32.mrf.mxu1 }
 0x5db   :  { %v1851_v14 = vpop.f32.mrf.mxu1 }
 0x5ed   :  { %1103 = vrot.lane.b32.xlu0 %v994_v45, %s2102_s2 }
 0x60c   :  { %1270 = vmax.xlane.f32.xlu0 %v1269_v15 }
 0x660   :  { %v1045_v16 = vpop.xlane.xlu0 %1044 }
 0x661   :  { %v1046_v17 = vsub.f32 %v1037_v8, %v1045_v16 }
 0x663   :  { %v1047_v18 = vmul.f32 1.442695, %v1046_v17 }
 0x664   :  { %v1104_v32 = vpop.permute.xlu0 %1103 }
 0x665   :  { %2076 = vpow2.f32 %v1047_v18 }
 0x672   :  { %v2077_v19 = vpop.eup %2076 }
 0x673   :  { %v1049_v20 = vsel %vm814_vm3, %v2077_v19, 0.0 }
 0x674   :  { %1050 = vadd.xlane.f32.xlu1 %v1049_v20 }
 0x685   :  { %1106 = vrot.lane.b32.xlu1 %v995_v60, %s2102_s2 }
 0x689   :  { %1332 = vrot.lane.b32.xlu1 %v2449_v56, %s2102_s2 }
 0x68d   :  { %1329 = vrot.lane.b32.xlu1 %v2462_v61, %s2102_s2 }
 0x691   :  { %1558 = vrot.lane.b32.xlu1 %v1447_v22, %s2102_s2 }
 0x695   :  { %1555 = vrot.lane.b32.xlu1 %v1446_v23, %s2102_s2  ;;  %v1271_v35 = vpop.xlane.xlu0 %1270 }
 0x696   :  { %v1272_v37 = vsub.f32 %v2481_v13, %v1271_v35 }
 0x698   :  { %v1273_v42 = vmul.f32 1.442695, %v1272_v37 }
 0x6fd   :  { %v1051_v24 = vpop.xlane.xlu1 %1050 }
 0x6fe   :  { %2078 = vrcp.f32 %v1051_v24 }
 0x6ff   :  { %2080 = vpow2.f32 %v1273_v42 }
 0x701   :  { %v1107_v25 = vpop.permute.xlu1 %1106 }
 0x702   :  { %v1112_v59 = vsel %vm767_vm1, %v1107_v25, 0 }
 0x705   :  { %v1333_v26 = vpop.permute.xlu1 %1332 }
 0x706   :  { %v1338_v27 = vsel %vm767_vm1, %v1333_v26, 0 }
 0x707   :  { %1883 = vmatpush3.bf16.xpose.msra.mxu0 %v1338_v27 }
 0x708   :  { %1894 = vmatprep.subr.bf16.mxu0 %v2100_v34 }
 0x709   :  { %v1330_v61 = vpop.permute.xlu1 %1329 }
 0x70b   :  { %v2079_v56 = vpop.eup %2078 }
 0x70c   :  { %v1053_v7 = vmul.f32 %v2079_v56, %v2077_v19  ;;  %v2571_v45 = vpop.eup %2080 }
 0x70d   :  { %v1559_v30 = vpop.permute.xlu1 %1558  ;;  %v1275_v50 = vsel %vm814_vm3, %v2571_v45, 0.0 }
 0x70e   :  { %1885 = vmatmul.mubr.msk.bf16.vlgmr.msra.gmra.mxu0 %vm767_vm1, %v1330_v61  ;;  %v1054_v29 = vpack.c.bf16 %v1053_v7, %v1053_v7  ;;  %v1564_v31 = vsel %vm767_vm1, %v1559_v30, 0  ;;  %v1222_v7 = vpack.c.bf16 %v2473_v6, %v2473_v6  ;;  %v762_v61 = vadd.f32 %v2478_v9, %v2506_v62 }
 0x70f   :  { %1895 = vmatpush3.bf16.xpose.msra.mxu0 %v1453_v28  ;;  %1896 = vmatprep.mubr.msk.bf16.mxu0 %vm2101_vm0, %v2100_v34 }
 0x710   :  { %1855 = vmatmul.mubr.msk.bf16.vlgmr.msra.gmra.mxu1 %vm814_vm3, %v1054_v29  ;;  %1906 = vmatprep.subr.bf16.mxu0 %v2100_v34  ;;  %v1448_v28 = vpack.c.bf16 %v762_v61, %v762_v61 }
 0x711   :  { %1859 = vmatpush3.bf16.xpose.msra.mxu1 %v1112_v59  ;;  %1860 = vmatprep.mubr.msk.bf16.mxu1 %vm2101_vm0, %v2100_v34  ;;  %v1556_v33 = vpop.permute.xlu1 %1555 }
 0x712   :  { %1864 = vmatprep.subr.bf16.mxu1 %v2100_v34 }
 0x716   :  { %1897 = vmatmul.mubr.msk.bf16.vlgmr.msra.gmra.mxu0 %vm767_vm1, %v1446_v23 }
 0x717   :  { %1907 = vmatpush3.bf16.xpose.msra.mxu0 %v1564_v31  ;;  %1908 = vmatprep.mubr.msk.bf16.mxu0 %vm2101_vm0, %v2100_v34 }
 0x718   :  { %1861 = vmatmul.mubr.msk.bf16.vlgmr.msra.gmra.mxu1 %vm767_vm1, %v1104_v32 }
 0x719   :  { %1866 = vmatprep.mubr.msk.bf16.mxu1 %vm2101_vm0, %v2100_v34 }
 0x71e   :  { %1909 = vmatmul.mubr.msk.bf16.vlgmr.msra.gmra.mxu0 %vm767_vm1, %v1556_v33 }
 0x7ce   :  { %v1374_v39 = vpop.f32.mrf.mxu0 }
 0x7cf   :  { %v1380_v63 = vsel %vm814_vm3, %v1374_v39, -inf }
 0x7d0   :  { %v1095_v40 = vpop.f32.mrf.mxu1  ;;  %v1886_v41 = vpop.f32.mrf.mxu0 }
 0x7d1   :  { %1101 = vst.msk [vmem:[%s2646_s3 + $0x8] sm:$0xff] %vm767_vm1, %v1095_v40 }
 0x7d2   :  { %v1856_v43 = vpop.f32.mrf.mxu1  ;;  %v1377_v44 = vpop.f32.mrf.mxu0 }
 0x7d4   :  { %v1098_v46 = vpop.f32.mrf.mxu1  ;;  %v1887_v47 = vpop.f32.mrf.mxu0 }
 0x7d6   :  { %v1857_v48 = vpop.f32.mrf.mxu1  ;;  %v1489_v49 = vpop.f32.mrf.mxu0 }
 0x7d7   :  { %v1495_v51 = vsel %vm814_vm3, %v1489_v49, -inf  ;;  %v1511_v48 = vsel %vm830_vm2, %v1448_v28, 0 }
 0x7d8   :  { %1496 = vmax.xlane.f32.xlu0 %v1495_v51  ;;  %v1148_v13 = vpop.f32.mrf.mxu1  ;;  %v1898_v52 = vpop.f32.mrf.mxu0 }
 0x7d9   :  { %v1154_v53 = vsel %vm814_vm3, %v1148_v13, -inf }
 0x7da   :  { %v1492_v55 = vpop.f32.mrf.mxu0  ;;  %1155 = vmax.xlane.f32.xlu1 %v1154_v53  ;;  %v1862_v57 = vpop.f32.mrf.mxu1 }
 0x7dc   :  { %v1151_v58 = vpop.f32.mrf.mxu1  ;;  %v1899_v60 = vpop.f32.mrf.mxu0 }
 0x7de   :  { %v1600_v0 = vpop.f32.mrf.mxu0  ;;  %1381 = vmax.xlane.f32.xlu1 %v1380_v63  ;;  %v1863_v1 = vpop.f32.mrf.mxu1 }
 0x7df   :  { %v1606_v36 = vsel %vm814_vm3, %v1600_v0, -inf }
 0x7e0   :  { %v1910_v3 = vpop.f32.mrf.mxu0 }
 0x7e2   :  { %v1603_v4 = vpop.f32.mrf.mxu0  ;;  %1607 = vmax.xlane.f32.xlu1 %v1606_v36 }
 0x7e4   :  { %v1911_v5 = vpop.f32.mrf.mxu0 }
 0x7e6   :  { %1276 = vadd.xlane.f32.xlu1 %v1275_v50 }
 0x861   :  { %v1497_v54 = vpop.xlane.xlu0 %1496 }
 0x862   :  { %v1498_v8 = vsub.f32 %v1489_v49, %v1497_v54 }
 0x863   :  { %v1156_v10 = vpop.xlane.xlu1 %1155 }
 0x864   :  { %v1499_v11 = vmul.f32 1.442695, %v1498_v8  ;;  %v1157_v12 = vsub.f32 %v1148_v13, %v1156_v10 }
 0x866   :  { %2082 = vpow2.f32 %v1499_v11  ;;  %v1158_v16 = vmul.f32 1.442695, %v1157_v12 }
 0x867   :  { %v1382_v14 = vpop.xlane.xlu1 %1381 }
 0x868   :  { %v1383_v15 = vsub.f32 %v1374_v39, %v1382_v14  ;;  %v1285_v39 = vsel %vm830_vm2, %v1222_v7, 0 }
 0x86a   :  { %v1384_v17 = vmul.f32 1.442695, %v1383_v15 }
 0x86b   :  { %v1608_v18 = vpop.xlane.xlu1 %1607 }
 0x86c   :  { %2084 = vpow2.f32 %v1384_v17  ;;  %v1609_v19 = vsub.f32 %v1600_v0, %v1608_v18 }
 0x86d   :  { %2086 = vpow2.f32 %v1158_v16 }
 0x86e   :  { %v1610_v20 = vmul.f32 1.442695, %v1609_v19 }
 0x86f   :  { %v1277_v29 = vpop.xlane.xlu1 %1276 }
 0x870   :  { %2088 = vpow2.f32 %v1610_v20 }
 0x873   :  { %v2083_v21 = vpop.eup %2082 }
 0x874   :  { %v1501_v22 = vsel %vm814_vm3, %v2083_v21, 0.0 }
 0x875   :  { %1502 = vadd.xlane.f32.xlu1 %v1501_v22 }
 0x879   :  { %v2085_v23 = vpop.eup %2084 }
 0x87a   :  { %v1386_v24 = vsel %vm814_vm3, %v2085_v23, 0.0  ;;  %v2087_v25 = vpop.eup %2086 }
 0x87b   :  { %1387 = vadd.xlane.f32.xlu0 %v1386_v24  ;;  %v1160_v27 = vsel %vm814_vm3, %v2087_v25, 0.0 }
 0x87d   :  { %v2577_v26 = vpop.eup %2088 }
 0x87e   :  { %v1612_v56 = vsel %vm814_vm3, %v2577_v26, 0.0 }
 0x87f   :  { %1161 = vadd.xlane.f32.xlu0 %v1160_v27  ;;  %1613 = vadd.xlane.f32.xlu1 %v1612_v56 }
 0x890   :  { %1393 = vrot.lane.b32.xlu1 %v1222_v7, %s2102_s2 }
 0x894   :  { %989 = vrot.lane.b32.xlu1 %v2525_v2, %s2102_s2 }
 0x895   :  { %1167 = vrot.lane.b32.xlu0 %v2517_v38, %s2102_s2 }
 0x899   :  { %1619 = vrot.lane.b32.xlu0 %v1448_v28, %s2102_s2 }
 0x8fe   :  { %v1503_v59 = vpop.xlane.xlu1 %1502 }
 0x904   :  { %v1388_v30 = vpop.xlane.xlu0 %1387 }
 0x908   :  { %v1162_v31 = vpop.xlane.xlu0 %1161  ;;  %v1614_v32 = vpop.xlane.xlu1 %1613 }
 0x909   :  { %2090 = vrcp.f32 %v1162_v31 }
 0x90a   :  { %2092 = vrcp.f32 %v1277_v29 }
 0x90b   :  { %2094 = vrcp.f32 %v1388_v30 }
 0x90c   :  { %v1168_v6 = vpop.permute.xlu0 %1167  ;;  %v1394_v33 = vpop.permute.xlu1 %1393  ;;  %2096 = vrcp.f32 %v1503_v59 }
 0x90d   :  { %v1173_v9 = vsel %vm830_vm2, %v1168_v6, 0  ;;  %v1399_v43 = vsel %vm830_vm2, %v1394_v33, 0  ;;  %2098 = vrcp.f32 %v1614_v32 }
 0x90e   :  { %1865 = vmatpush3.bf16.msra.mxu1 %v1173_v9 }
 0x90f   :  { %1876 = vmatprep.subr.bf16.mxu1 %v2100_v34 }
 0x910   :  { %v990_v62 = vpop.permute.xlu1 %989  ;;  %v1620_v51 = vpop.permute.xlu0 %1619 }
 0x911   :  { %993 = vst.msk [vmem:[%s2646_s3] sm:$0xff] %vm992_vm4, %v990_v62  ;;  %v1625_v53 = vsel %vm830_vm2, %v1620_v51, 0 }
 0x916   :  { %v2091_v38 = vpop.eup %2090 }
 0x917   :  { %v1164_v2 = vmul.f32 %v2091_v38, %v2087_v25  ;;  %v2093_v37 = vpop.eup %2092 }
 0x918   :  { %v1279_v40 = vmul.f32 %v2093_v37, %v2571_v45  ;;  %v2095_v42 = vpop.eup %2094 }
 0x919   :  { %v1165_v35 = vpack.c.bf16 %v1164_v2, %v1164_v2  ;;  %v1390_v44 = vmul.f32 %v2095_v42, %v2085_v23  ;;  %v2097_v47 = vpop.eup %2096 }
 0x91a   :  { %v1280_v41 = vpack.c.bf16 %v1279_v40, %v1279_v40  ;;  %v1505_v49 = vmul.f32 %v2097_v47, %v2083_v21  ;;  %v2099_v52 = vpop.eup %2098 }
 0x91b   :  { %1867 = vmatmul.mubr.msk.bf16.vlgmr.msra.gmra.mxu1 %vm814_vm3, %v1165_v35  ;;  %v1391_v46 = vpack.c.bf16 %v1390_v44, %v1390_v44  ;;  %v1616_v55 = vmul.f32 %v2099_v52, %v2577_v26 }
 0x91c   :  { %1877 = vmatpush3.bf16.msra.mxu1 %v1285_v39  ;;  %1878 = vmatprep.mubr.msk.bf16.mxu1 %vm2101_vm0, %v2100_v34  ;;  %v1506_v13 = vpack.c.bf16 %v1505_v49, %v1505_v49 }
 0x91d   :  { %1888 = vmatprep.subr.bf16.mxu1 %v2100_v34  ;;  %v1617_v57 = vpack.c.bf16 %v1616_v55, %v1616_v55 }
 0x923   :  { %1879 = vmatmul.mubr.msk.bf16.vlgmr.msra.gmra.mxu1 %vm814_vm3, %v1280_v41 }
 0x924   :  { %1889 = vmatpush3.bf16.msra.mxu1 %v1399_v43  ;;  %1890 = vmatprep.mubr.msk.bf16.mxu1 %vm2101_vm0, %v2100_v34 }
 0x925   :  { %1900 = vmatprep.subr.bf16.mxu1 %v2100_v34 }
 0x92b   :  { %1891 = vmatmul.mubr.msk.bf16.vlgmr.msra.gmra.mxu1 %vm814_vm3, %v1391_v46 }
 0x92c   :  { %1901 = vmatpush3.bf16.msra.mxu1 %v1511_v48  ;;  %1902 = vmatprep.mubr.msk.bf16.mxu1 %vm2101_vm0, %v2100_v34 }
 0x92d   :  { %1912 = vmatprep.subr.bf16.mxu1 %v2100_v34 }
 0x933   :  { %1903 = vmatmul.mubr.msk.bf16.vlgmr.msra.gmra.mxu1 %vm814_vm3, %v1506_v13 }
 0x934   :  { %1913 = vmatpush3.bf16.msra.mxu1 %v1625_v53  ;;  %1914 = vmatprep.mubr.msk.bf16.mxu1 %vm2101_vm0, %v2100_v34 }
 0x93b   :  { %1915 = vmatmul.mubr.msk.bf16.vlgmr.msra.gmra.mxu1 %vm814_vm3, %v1617_v57 }
 0x9db   :  { %v1209_v58 = vpop.f32.mrf.mxu1 }
 0x9dc   :  { %1216 = vrot.lane.b32.xlu0 %v1209_v58, %s2102_s2 }
 0x9dd   :  { %v1868_v60 = vpop.f32.mrf.mxu1 }
 0x9df   :  { %v1212_v63 = vpop.f32.mrf.mxu1 }
 0x9e1   :  { %v1869_v0 = vpop.f32.mrf.mxu1 }
 0x9e3   :  { %v1321_v1 = vpop.f32.mrf.mxu1 }
 0x9e4   :  { %1327 = vst.msk [vmem:[%s2646_s3 + $0x10] sm:$0xff] %vm767_vm1, %v1321_v1 }
 0x9e5   :  { %v1880_v3 = vpop.f32.mrf.mxu1 }
 0x9e7   :  { %v1324_v36 = vpop.f32.mrf.mxu1 }
 0x9e9   :  { %v1881_v34 = vpop.f32.mrf.mxu1 }
 0x9eb   :  { %v1435_v45 = vpop.f32.mrf.mxu1 }
 0x9ec   :  { %1442 = vrot.lane.b32.xlu1 %v1435_v45, %s2102_s2 }
 0x9ed   :  { %v1892_v4 = vpop.f32.mrf.mxu1 }
 0x9ef   :  { %v1438_v5 = vpop.f32.mrf.mxu1 }
 0x9f1   :  { %v1893_v50 = vpop.f32.mrf.mxu1 }
 0x9f3   :  { %v1547_v54 = vpop.f32.mrf.mxu1 }
 0x9f4   :  { %1553 = vst.msk [vmem:[%s2646_s3 + $0x18] sm:$0xff] %vm767_vm1, %v1547_v54 }
 0x9f5   :  { %v1904_v8 = vpop.f32.mrf.mxu1 }
 0x9f7   :  { %v1550_v10 = vpop.f32.mrf.mxu1 }
 0x9f9   :  { %v1905_v11 = vpop.f32.mrf.mxu1 }
 0x9fb   :  { %v1661_v12 = vpop.f32.mrf.mxu1 }
 0x9fc   :  { %1668 = vrot.lane.b32.xlu0 %v1661_v12, %s2102_s2 }
 0x9fd   :  { %v1916_v14 = vpop.f32.mrf.mxu1 }
 0x9ff   :  { %v1664_v15 = vpop.f32.mrf.mxu1 }
 0xa01   :  { %v1917_v16 = vpop.f32.mrf.mxu1 }
 0xa4e   :  { %v1217_v17 = vpop.permute.xlu0 %1216 }
 0xa4f   :  { %1219 = vst.msk [vmem:[%s2646_s3 + $0x8] sm:$0xff] %vm992_vm4, %v1217_v17 }
 0xa5e   :  { %v1443_v18 = vpop.permute.xlu1 %1442 }
 0xa5f   :  { %1445 = vst.msk [vmem:[%s2646_s3 + $0x10] sm:$0xff] %vm992_vm4, %v1443_v18 }
 0xa6e   :  { %v1669_v19 = vpop.permute.xlu0 %1668 }
 0xa6f   :  { %1671 = vst.msk [vmem:[%s2646_s3 + $0x18] sm:$0xff] %vm992_vm4, %v1669_v19 }

// kernel: transformer_block_single.3
= control target key start
LH: loop header
LB: loop body
LE: loop exit
PB: predicated region body
PF: predicated region fallthrough
CT: control target
= control target key end

     0   :  { %v55_v0 = vlaneseq  ;;  %s727_s5 = smov 127   ;;  %s728_s12 = smov 1   ;;  %vm83_vm0 = vcmask 1039360   ;;  %vm46_vm1 = vcmask 7168   ;;  %vm225_vm2 = vcmask 982016   ;;  %s1418_s0 = inlined_call_operand.vmem [shape: f32[8,512], index: 0, kind: input, shape index: {}]   ;;  %s1419_s1 = inlined_call_operand.vmem [shape: f32[8,512], index: 1, kind: input, shape index: {}]   ;;  %s1420_s2 = inlined_call_operand.vmem [shape: f32[6,512], index: 2, kind: input, shape index: {}]   ;;  %s1421_s3 = inlined_call_operand.vmem [shape: f32[8,224], index: 3, kind: input, shape index: {}]   ;;  %s1422_s4 = inlined_call_operand.vmem [shape: f32[8,512], index: 4, kind: output, shape index: {}]  }
   0x1   :  { %v19_v1 = vld [vmem:[%s1418_s0 + $0x10] sm:$0xff]  ;;  %v17_v3 = vld [vmem:[%s1418_s0] sm:$0xff]  ;;  %v20_v6 = vld [vmem:[%s1418_s0 + $0x18] sm:$0xff]  ;;  %s730_s13 = smov 8   ;;  %s731_s14 = smov 64   ;;  %vm386_vm3 = vcmask 523264  }
   0x2   :  { %v23_v2 = vld [vmem:[%s1419_s1 + $0x10] sm:$0xff]  ;;  %v21_v5 = vld [vmem:[%s1419_s1] sm:$0xff]  ;;  %v24_v7 = vld [vmem:[%s1419_s1 + $0x18] sm:$0xff]  ;;  %v778_v8 = vshrl.u32 %v55_v0, 7  ;;  %vm148_vm4 = vcmask 64512   ;;  %vm565_vm5 = vcmask 785408  }
   0x3   :  { %v767_v4 = vadd.f32 %v23_v2, %v19_v1  ;;  %v780_v9 = vadd.f32 %v21_v5, %v17_v3  ;;  %v18_v10 = vld [vmem:[%s1418_s0 + $0x8] sm:$0xff]  ;;  %v789_v12 = vadd.f32 %v24_v7, %v20_v6  ;;  %v799_v16 = vld [vmem:[%s1420_s2 + $0x10] sm:$0x3f]  ;;  %v804_v17 = vld [vmem:[%s1420_s2 + $0x18] sm:$0x3f] }
   0x4   :  { %v22_v11 = vld [vmem:[%s1419_s1 + $0x8] sm:$0xff]  ;;  %v461_v13 = vsub.s32 4, %v778_v8  ;;  %v513_v14 = vsub.s32 5, %v778_v8  ;;  %v821_v22 = vld [vmem:[%s1420_s2] sm:$0x3f]  ;;  %v95_v28 = vsub.s32 1, %v778_v8 }
   0x5   :  { %79 = vrot.lane.b32.xlu1 %v767_v4, %s727_s5  ;;  %75 = vrot.lane.b32.xlu0 %v780_v9, %s727_s5  ;;  %v794_v15 = vadd.f32 %v22_v11, %v18_v10  ;;  %v826_v23 = vld [vmem:[%s1420_s2 + $0x8] sm:$0x3f]  ;;  %s729_s2 = smov 120   ;;  %v57_v37 = vsub.s32 0, %v778_v8  ;;  %v255_v5 = vsub.s32 3, %v778_v8 }
   0x6   :  { %v807_v18 = vrot.slane %v799_v16, %v461_v13  ;;  %v810_v19 = vrot.slane %v804_v17, %v461_v13  ;;  %v813_v20 = vrot.slane %v799_v16, %v513_v14  ;;  %v816_v21 = vrot.slane %v804_v17, %v513_v14 }
   0x7   :  { %v830_v24 = vrot.slane %v821_v22, %v461_v13  ;;  %v833_v25 = vrot.slane %v826_v23, %v461_v13  ;;  %v836_v26 = vrot.slane %v821_v22, %v513_v14  ;;  %v839_v27 = vrot.slane %v826_v23, %v513_v14 }
   0x8   :  { %v96_v31 = vrot.slane %v821_v22, %v95_v28  ;;  %v100_v32 = vrot.slane %v826_v23, %v95_v28  ;;  %v104_v38 = vrot.slane %v799_v16, %v95_v28  ;;  %v108_v39 = vrot.slane %v804_v17, %v95_v28 }
   0x9   :  { %81 = vrot.lane.b32.xlu1 %v789_v12, %s727_s5  ;;  %77 = vrot.lane.b32.xlu0 %v794_v15, %s727_s5  ;;  %v58_v48 = vrot.slane %v821_v22, %v57_v37  ;;  %v62_v49 = vrot.slane %v826_v23, %v57_v37  ;;  %v70_v55 = vrot.slane %v804_v17, %v57_v37 }
   0xa   :  { %v66_v56 = vrot.slane %v799_v16, %v57_v37  ;;  %v928_v10 = vrot.slane %v821_v22, %v255_v5  ;;  %v935_v13 = vrot.slane %v804_v17, %v255_v5 }
   0xd   :  { %40 = vrot.lane.b32.xlu1 %v780_v9, %s728_s12  ;;  %34 = vrot.lane.b32.xlu0 %v789_v12, %s728_s12 }
  0x11   :  { %44 = vrot.lane.b32.xlu1 %v767_v4, %s728_s12  ;;  %42 = vrot.lane.b32.xlu0 %v794_v15, %s728_s12 }
  0x15   :  { %211 = vrot.lane.b32.xlu1 %v794_v15, %s729_s2  ;;  %209 = vrot.lane.b32.xlu0 %v780_v9, %s729_s2 }
  0x19   :  { %215 = vrot.lane.b32.xlu1 %v789_v12, %s729_s2  ;;  %213 = vrot.lane.b32.xlu0 %v767_v4, %s729_s2 }
  0x1d   :  { %136 = vrot.lane.b32.xlu1 %v780_v9, %s730_s13  ;;  %117 = vrot.lane.b32.xlu0 %v789_v12, %s730_s13 }
  0x21   :  { %140 = vrot.lane.b32.xlu1 %v767_v4, %s730_s13  ;;  %138 = vrot.lane.b32.xlu0 %v794_v15, %s730_s13 }
  0x25   :  { %356 = vrot.lane.b32.xlu1 %v780_v9, %s731_s14  ;;  %295 = vrot.lane.b32.xlu0 %v789_v12, %s731_s14 }
  0x29   :  { %360 = vrot.lane.b32.xlu1 %v767_v4, %s731_s14  ;;  %358 = vrot.lane.b32.xlu0 %v794_v15, %s731_s14 }
  0x77   :  { %v80_v29 = vpop.permute.xlu1 %79  ;;  %v76_v30 = vpop.permute.xlu0 %75 }
  0x7b   :  { %v82_v33 = vpop.permute.xlu1 %81  ;;  %v78_v34 = vpop.permute.xlu0 %77 }
  0x7c   :  { %v84_v35 = vsel %vm83_vm0, %v76_v30, %v78_v34  ;;  %v85_v36 = vsel %vm83_vm0, %v78_v34, %v80_v29  ;;  %v86_v42 = vsel %vm83_vm0, %v80_v29, %v82_v33  ;;  %v92_v43 = vsel %vm83_vm0, %v82_v33, %v76_v30 }
  0x7d   :  { %v876_v40 = vmul.f32 %v96_v31, %v84_v35  ;;  %v878_v41 = vmul.f32 %v100_v32, %v85_v36  ;;  %v884_v46 = vmul.f32 %v104_v38, %v86_v42  ;;  %v886_v47 = vmul.f32 %v108_v39, %v92_v43 }
  0x7e   :  { %v950_v34 = vrot.slane %v826_v23, %v255_v5  ;;  %v953_v35 = vrot.slane %v799_v16, %v255_v5 }
  0x7f   :  { %v41_v44 = vpop.permute.xlu1 %40  ;;  %219 = vrot.lane.b32.xlu1 %v878_v41, %s729_s2  ;;  %217 = vrot.lane.b32.xlu0 %v876_v40, %s729_s2  ;;  %v35_v45 = vpop.permute.xlu0 %34 }
  0x80   :  { %v54_v50 = vsel %vm46_vm1, %v35_v45, %v41_v44 }
  0x81   :  { %v896_v54 = vmul.f32 %v58_v48, %v54_v50 }
  0x83   :  { %v45_v51 = vpop.permute.xlu1 %44  ;;  %223 = vrot.lane.b32.xlu1 %v886_v47, %s729_s2  ;;  %221 = vrot.lane.b32.xlu0 %v884_v46, %s729_s2  ;;  %v43_v52 = vpop.permute.xlu0 %42 }
  0x84   :  { %v47_v53 = vsel %vm46_vm1, %v41_v44, %v43_v52  ;;  %v49_v58 = vsel %vm46_vm1, %v45_v51, %v35_v45  ;;  %v48_v59 = vsel %vm46_vm1, %v43_v52, %v45_v51 }
  0x85   :  { %v900_v57 = vmul.f32 %v62_v49, %v47_v53  ;;  %v908_v62 = vmul.f32 %v70_v55, %v49_v58  ;;  %v910_v63 = vmul.f32 %v66_v56, %v48_v59  ;;  %v175_v53 = vsub.s32 2, %v778_v8 }
  0x87   :  { %v212_v60 = vpop.permute.xlu1 %211  ;;  %201 = vrot.lane.b32.xlu0 %v896_v54, %s729_s2  ;;  %203 = vrot.lane.b32.xlu1 %v900_v57, %s729_s2  ;;  %v210_v61 = vpop.permute.xlu0 %209  ;;  %v1012_v55 = vrot.slane %v821_v22, %v175_v53  ;;  %v1015_v56 = vrot.slane %v804_v17, %v175_v53  ;;  %v1021_v8 = vrot.slane %v826_v23, %v175_v53 }
  0x88   :  { %v229_v14 = vsel %vm225_vm2, %v210_v61, %v212_v60 }
  0x89   :  { %v947_v33 = vmul.f32 %v928_v10, %v229_v14 }
  0x8b   :  { %v216_v0 = vpop.permute.xlu1 %215  ;;  %205 = vrot.lane.b32.xlu0 %v910_v63, %s729_s2  ;;  %207 = vrot.lane.b32.xlu1 %v908_v62, %s729_s2  ;;  %v214_v1 = vpop.permute.xlu0 %213 }
  0x8c   :  { %v251_v29 = vsel %vm225_vm2, %v216_v0, %v210_v61  ;;  %v230_v38 = vsel %vm225_vm2, %v212_v60, %v214_v1  ;;  %v231_v43 = vsel %vm225_vm2, %v214_v1, %v216_v0  ;;  %v1034_v60 = vrot.slane %v799_v16, %v175_v53 }
  0x8d   :  { %v962_v37 = vmul.f32 %v935_v13, %v251_v29  ;;  %v989_v51 = vmul.f32 %v950_v34, %v230_v38  ;;  %v992_v52 = vmul.f32 %v953_v35, %v231_v43 }
  0x8f   :  { %v916_v2 = vpop.permute.xlu1 %136  ;;  %119 = vrot.lane.b32.xlu0 %v886_v47, %s730_s13  ;;  %142 = vrot.lane.b32.xlu1 %v876_v40, %s730_s13  ;;  %v118_v3 = vpop.permute.xlu0 %117 }
  0x90   :  { %v171_v59 = vsel %vm148_vm4, %v118_v3, %v916_v2 }
  0x91   :  { %v1028_v22 = vmul.f32 %v1012_v55, %v171_v59 }
  0x93   :  { %v141_v6 = vpop.permute.xlu1 %140  ;;  %144 = vrot.lane.b32.xlu0 %v878_v41, %s730_s13  ;;  %146 = vrot.lane.b32.xlu1 %v884_v46, %s730_s13  ;;  %v139_v7 = vpop.permute.xlu0 %138 }
  0x94   :  { %v154_v58 = vsel %vm148_vm4, %v141_v6, %v118_v3  ;;  %v152_v61 = vsel %vm148_vm4, %v916_v2, %v139_v7  ;;  %v153_v23 = vsel %vm148_vm4, %v139_v7, %v141_v6 }
  0x95   :  { %v1031_v17 = vmul.f32 %v1015_v56, %v154_v58  ;;  %v1044_v0 = vmul.f32 %v1021_v8, %v152_v61  ;;  %v1047_v1 = vmul.f32 %v1034_v60, %v153_v23 }
  0x97   :  { %v357_v11 = vpop.permute.xlu1 %356  ;;  %115 = vrot.lane.b32.xlu0 %v908_v62, %s730_s13  ;;  %130 = vrot.lane.b32.xlu1 %v896_v54, %s730_s13  ;;  %v296_v28 = vpop.permute.xlu0 %295 }
  0x98   :  { %v454_v30 = vsel %vm386_vm3, %v296_v28, %v357_v11 }
  0x99   :  { %v941_v31 = vmul.f32 %v830_v24, %v454_v30  ;;  %v944_v32 = vmul.f32 %v816_v21, %v454_v30 }
  0x9b   :  { %v955_v36 = vpop.permute.xlu1 %360  ;;  %132 = vrot.lane.b32.xlu0 %v900_v57, %s730_s13  ;;  %134 = vrot.lane.b32.xlu1 %v910_v63, %s730_s13  ;;  %v965_v39 = vpop.permute.xlu0 %358 }
  0x9c   :  { %v401_v42 = vsel %vm386_vm3, %v955_v36, %v296_v28  ;;  %v399_v44 = vsel %vm386_vm3, %v357_v11, %v965_v39 }
  0x9d   :  { %v973_v45 = vmul.f32 %v810_v19, %v401_v42  ;;  %v976_v48 = vmul.f32 %v813_v20, %v401_v42  ;;  %v979_v49 = vmul.f32 %v833_v25, %v399_v44  ;;  %v982_v50 = vmul.f32 %v836_v26, %v399_v44 }
  0x9f   :  { %301 = vrot.lane.b32.xlu0 %v962_v37, %s731_s14  ;;  %374 = vrot.lane.b32.xlu1 %v947_v33, %s731_s14 }
  0xa3   :  { %378 = vrot.lane.b32.xlu1 %v992_v52, %s731_s14  ;;  %376 = vrot.lane.b32.xlu0 %v989_v51, %s731_s14 }
  0xa7   :  { %362 = vrot.lane.b32.xlu1 %v876_v40, %s731_s14  ;;  %297 = vrot.lane.b32.xlu0 %v886_v47, %s731_s14 }
  0xab   :  { %366 = vrot.lane.b32.xlu1 %v884_v46, %s731_s14  ;;  %364 = vrot.lane.b32.xlu0 %v878_v41, %s731_s14 }
  0xaf   :  { %350 = vrot.lane.b32.xlu1 %v896_v54, %s731_s14  ;;  %293 = vrot.lane.b32.xlu0 %v908_v62, %s731_s14 }
  0xb3   :  { %354 = vrot.lane.b32.xlu1 %v910_v63, %s731_s14  ;;  %352 = vrot.lane.b32.xlu0 %v900_v57, %s731_s14 }
  0xb7   :  { %338 = vrot.lane.b32.xlu1 %v1028_v22, %s731_s14  ;;  %289 = vrot.lane.b32.xlu0 %v1031_v17, %s731_s14 }
  0xbb   :  { %342 = vrot.lane.b32.xlu1 %v1047_v1, %s731_s14  ;;  %340 = vrot.lane.b32.xlu0 %v1044_v0, %s731_s14 }
  0xf1   :  { %v220_v16 = vpop.permute.xlu1 %219  ;;  %v218_v2 = vpop.permute.xlu0 %217 }
  0xf2   :  { %v232_v3 = vsel %vm225_vm2, %v218_v2, %v220_v16 }
  0xf3   :  { %v1055_v5 = vmul.f32 %v928_v10, %v232_v3 }
  0xf5   :  { %v224_v6 = vpop.permute.xlu1 %223  ;;  %380 = vrot.lane.b32.xlu1 %v1055_v5, %s731_s14  ;;  %v222_v7 = vpop.permute.xlu0 %221 }
  0xf6   :  { %v252_v11 = vsel %vm225_vm2, %v224_v6, %v218_v2  ;;  %v234_v14 = vsel %vm225_vm2, %v222_v7, %v224_v6  ;;  %v233_v30 = vsel %vm225_vm2, %v220_v16, %v222_v7 }
  0xf7   :  { %v1062_v28 = vmul.f32 %v935_v13, %v252_v11  ;;  %v1065_v29 = vmul.f32 %v953_v35, %v234_v14  ;;  %v1074_v44 = vmul.f32 %v950_v34, %v233_v30 }
  0xf9   :  { %v204_v38 = vpop.permute.xlu1 %203  ;;  %303 = vrot.lane.b32.xlu0 %v1062_v28, %s731_s14  ;;  %384 = vrot.lane.b32.xlu1 %v1065_v29, %s731_s14  ;;  %v202_v42 = vpop.permute.xlu0 %201 }
  0xfa   :  { %v226_v43 = vsel %vm225_vm2, %v202_v42, %v204_v38 }
  0xfb   :  { %v269_v53 = vmul.f32 %v928_v10, %v226_v43 }
  0xfd   :  { %v208_v58 = vpop.permute.xlu1 %207  ;;  %382 = vrot.lane.b32.xlu0 %v1074_v44, %s731_s14  ;;  %368 = vrot.lane.b32.xlu1 %v269_v53, %s731_s14  ;;  %v206_v59 = vpop.permute.xlu0 %205 }
  0xfe   :  { %v250_v61 = vsel %vm225_vm2, %v208_v58, %v202_v42  ;;  %v227_v23 = vsel %vm225_vm2, %v204_v38, %v206_v59  ;;  %v228_v16 = vsel %vm225_vm2, %v206_v59, %v208_v58 }
  0xff   :  { %v272_v2 = vmul.f32 %v935_v13, %v250_v61  ;;  %v271_v3 = vmul.f32 %v953_v35, %v228_v16  ;;  %v270_v6 = vmul.f32 %v950_v34, %v227_v23 }
 0x101   :  { %v143_v10 = vpop.permute.xlu1 %142  ;;  %299 = vrot.lane.b32.xlu0 %v272_v2, %s731_s14  ;;  %640 = vmatprep.subr.mxu1 %v272_v2  ;;  %v120_v7 = vpop.permute.xlu0 %119 }
 0x102   :  { %372 = vrot.lane.b32.xlu1 %v271_v3, %s731_s14  ;;  %569 = vmatprep.subr.mxu0 %v270_v6  ;;  %v172_v11 = vsel %vm148_vm4, %v120_v7, %v143_v10 }
 0x103   :  { %v197_v14 = vmul.f32 %v1012_v55, %v172_v11  ;;  %570 = vmatpush1.msra.mxu0 %v269_v53  ;;  %641 = vmatpush1.msra.mxu1 %v271_v3 }
 0x104   :  { %571 = vmatprep.subr.mxu0 %v878_v41  ;;  %642 = vmatprep.subr.mxu1 %v886_v47 }
 0x105   :  { %572 = vmatpush1.msra.mxu0 %v876_v40  ;;  %643 = vmatpush1.msra.mxu1 %v884_v46  ;;  %v147_v13 = vpop.permute.xlu1 %146  ;;  %v145_v34 = vpop.permute.xlu0 %144 }
 0x106   :  { %v157_v35 = vsel %vm148_vm4, %v147_v13, %v120_v7  ;;  %644 = vmatprep.subr.mxu1 %v789_v12  ;;  %370 = vrot.lane.b32.xlu0 %v270_v6, %s731_s14  ;;  %v155_v30 = vsel %vm148_vm4, %v143_v10, %v145_v34  ;;  %v156_v38 = vsel %vm148_vm4, %v145_v34, %v147_v13 }
 0x107   :  { %v200_v41 = vmul.f32 %v1015_v56, %v157_v35  ;;  %573 = vmatprep.subr.mxu0 %v794_v15  ;;  %344 = vrot.lane.b32.xlu1 %v197_v14, %s731_s14  ;;  %v198_v40 = vmul.f32 %v1021_v8, %v155_v30  ;;  %v199_v46 = vmul.f32 %v1034_v60, %v156_v38 }
 0x108   :  { %574 = vmatpush1.msra.mxu0 %v780_v9  ;;  %645 = vmatpush1.msra.mxu1 %v767_v4 }
 0x109   :  { %575 = vmatprep.subr.mxu0 %v900_v57  ;;  %646 = vmatprep.subr.mxu1 %v908_v62  ;;  %v131_v12 = vpop.permute.xlu1 %130  ;;  %v116_v47 = vpop.permute.xlu0 %115 }
 0x10a   :  { %576 = vmatpush1.msra.mxu0 %v896_v54  ;;  %647 = vmatpush1.msra.mxu1 %v910_v63  ;;  %v170_v15 = vsel %vm148_vm4, %v116_v47, %v131_v12 }
 0x10b   :  { %291 = vrot.lane.b32.xlu0 %v200_v41, %s731_s14  ;;  %648 = vmatprep.subr.mxu1 %v200_v41  ;;  %v189_v4 = vmul.f32 %v1012_v55, %v170_v15 }
 0x10c   :  { %348 = vrot.lane.b32.xlu1 %v199_v46, %s731_s14  ;;  %577 = vmatprep.subr.mxu0 %v198_v40 }
 0x10d   :  { %578 = vmatpush1.msra.mxu0 %v197_v14  ;;  %649 = vmatpush1.msra.mxu1 %v199_v46  ;;  %v135_v9 = vpop.permute.xlu1 %134  ;;  %v133_v57 = vpop.permute.xlu0 %132 }
 0x10e   :  { %579 = vmatprep.subr.mxu0 %v1044_v0  ;;  %650 = vmatprep.subr.mxu1 %v1031_v17  ;;  %v151_v54 = vsel %vm148_vm4, %v135_v9, %v116_v47  ;;  %v149_v62 = vsel %vm148_vm4, %v131_v12, %v133_v57  ;;  %v150_v63 = vsel %vm148_vm4, %v133_v57, %v135_v9 }
 0x10f   :  { %580 = vmatpush1.msra.mxu0 %v1028_v22  ;;  %651 = vmatpush1.msra.mxu1 %v1047_v1  ;;  %v192_v55 = vmul.f32 %v1015_v56, %v151_v54  ;;  %v190_v42 = vmul.f32 %v1021_v8, %v149_v62  ;;  %v191_v43 = vmul.f32 %v1034_v60, %v150_v63  ;;  %v564_v56 = vld [vmem:[%s1421_s3 + $0x8] sm:$0xff] }
 0x110   :  { %346 = vrot.lane.b32.xlu0 %v198_v40, %s731_s14  ;;  %332 = vrot.lane.b32.xlu1 %v189_v4, %s731_s14 }
 0x111   :  { %652 = vmatprep.subr.mxu1 %v192_v55  ;;  %581 = vmatprep.subr.mxu0 %v190_v42  ;;  %v375_v8 = vpop.permute.xlu1 %374  ;;  %v302_v22 = vpop.permute.xlu0 %301 }
 0x112   :  { %582 = vmatpush1.msra.mxu0 %v189_v4  ;;  %653 = vmatpush1.msra.mxu1 %v191_v43  ;;  %v1168_v15 = vsel %vm386_vm3, %v302_v22, %v375_v8 }
 0x113   :  { %720 = vmatprep.mubr.msk.f32.mxu1 %vm565_vm5, %v564_v56  ;;  %719 = vmatprep.mubr.msk.f32.mxu0 %vm565_vm5, %v564_v56 }
 0x114   :  { %287 = vrot.lane.b32.xlu0 %v192_v55, %s731_s14  ;;  %336 = vrot.lane.b32.xlu1 %v191_v43, %s731_s14 }
 0x115   :  { %v379_v17 = vpop.permute.xlu1 %378  ;;  %v377_v60 = vpop.permute.xlu0 %376 }
 0x116   :  { %v1150_v35 = vsel %vm386_vm3, %v379_v17, %v302_v22  ;;  %v1156_v40 = vsel %vm386_vm3, %v375_v8, %v377_v60  ;;  %v1159_v46 = vsel %vm386_vm3, %v377_v60, %v379_v17 }
 0x117   :  { %v506_v57 = vmul.f32 %v810_v19, %v1150_v35  ;;  %v504_v62 = vmul.f32 %v833_v25, %v1156_v40  ;;  %v505_v63 = vmul.f32 %v807_v18, %v1159_v46 }
 0x118   :  { %334 = vrot.lane.b32.xlu0 %v190_v42, %s731_s14  ;;  %v503_v42 = vmul.f32 %v830_v24, %v1168_v15 }
 0x119   :  { %v363_v0 = vpop.permute.xlu1 %362  ;;  %v298_v1 = vpop.permute.xlu0 %297 }
 0x11d   :  { %v367_v53 = vpop.permute.xlu1 %366  ;;  %v365_v58 = vpop.permute.xlu0 %364 }
 0x11e   :  { %v1190_v22 = vsel %vm386_vm3, %v367_v53, %v298_v1 }
 0x121   :  { %v1132_v59 = vpop.permute.xlu1 %350  ;;  %v1134_v61 = vpop.permute.xlu0 %293 }
 0x125   :  { %v355_v23 = vpop.permute.xlu1 %354  ;;  %v353_v16 = vpop.permute.xlu0 %352 }
 0x129   :  { %v1136_v2 = vpop.permute.xlu1 %338  ;;  %v1138_v3 = vpop.permute.xlu0 %289 }
 0x12d   :  { %v1140_v6 = vpop.permute.xlu1 %342  ;;  %v1142_v10 = vpop.permute.xlu0 %340 }
 0x167   :  { %v381_v7 = vpop.permute.xlu1 %380 }
 0x16b   :  { %v385_v11 = vpop.permute.xlu1 %384  ;;  %v304_v14 = vpop.permute.xlu0 %303 }
 0x16c   :  { %v1145_v13 = vsel %vm386_vm3, %v385_v11, %v304_v14  ;;  %v1153_v30 = vsel %vm386_vm3, %v304_v14, %v381_v7 }
 0x16d   :  { %v510_v34 = vmul.f32 %v810_v19, %v1145_v13  ;;  %v507_v54 = vmul.f32 %v830_v24, %v1153_v30 }
 0x16f   :  { %v369_v38 = vpop.permute.xlu1 %368  ;;  %654 = vmatprep.subr.mxu1 %v510_v34  ;;  %v383_v41 = vpop.permute.xlu0 %382 }
 0x170   :  { %v1162_v12 = vsel %vm386_vm3, %v381_v7, %v383_v41  ;;  %v1165_v47 = vsel %vm386_vm3, %v383_v41, %v385_v11  ;;  %v1196_v7 = vsel %vm386_vm3, %v363_v0, %v365_v58  ;;  %v1199_v11 = vsel %vm386_vm3, %v365_v58, %v367_v53 }
 0x171   :  { %v508_v4 = vmul.f32 %v833_v25, %v1162_v12  ;;  %v509_v9 = vmul.f32 %v807_v18, %v1165_v47  ;;  %v1217_v53 = vsel %vm386_vm3, %v965_v39, %v955_v36  ;;  %v498_v58 = vmul.f32 %v810_v19, %v1190_v22 }
 0x172   :  { %v1235_v39 = vsel %vm386_vm3, %v1132_v59, %v353_v16 }
 0x173   :  { %583 = vmatprep.subr.mxu0 %v508_v4  ;;  %655 = vmatpush1.msra.mxu1 %v509_v9  ;;  %v300_v55 = vpop.permute.xlu0 %299  ;;  %v1208_v4 = vsel %vm386_vm3, %v298_v1, %v363_v0  ;;  %v496_v0 = vmul.f32 %v833_v25, %v1196_v7  ;;  %v497_v1 = vmul.f32 %v807_v18, %v1199_v11 }
 0x174   :  { %v373_v43 = vpop.permute.xlu1 %372  ;;  %584 = vmatpush1.msra.mxu0 %v507_v54  ;;  %656 = vmatprep.subr.mxu1 %v506_v57  ;;  %v1193_v17 = vsel %vm386_vm3, %v300_v55, %v369_v38  ;;  %v1229_v54 = vsel %vm386_vm3, %v355_v23, %v1134_v61  ;;  %v495_v36 = vmul.f32 %v830_v24, %v1208_v4 }
 0x175   :  { %v1185_v56 = vsel %vm386_vm3, %v373_v43, %v300_v55  ;;  %585 = vmatprep.subr.mxu0 %v504_v62  ;;  %657 = vmatpush1.msra.mxu1 %v505_v63  ;;  %v1238_v62 = vsel %vm386_vm3, %v353_v16, %v355_v23  ;;  %v493_v55 = vmul.f32 %v807_v18, %v1217_v53 }
 0x176   :  { %v502_v8 = vmul.f32 %v810_v19, %v1185_v56  ;;  %586 = vmatpush1.msra.mxu0 %v503_v42  ;;  %v1245_v42 = vsel %vm386_vm3, %v1134_v61, %v1132_v59  ;;  %v488_v16 = vmul.f32 %v833_v25, %v1235_v39 }
 0x177   :  { %v487_v59 = vmul.f32 %v830_v24, %v1245_v42 }
 0x178   :  { %658 = vmatprep.subr.mxu1 %v502_v8  ;;  %v371_v60 = vpop.permute.xlu0 %370  ;;  %v490_v8 = vmul.f32 %v810_v19, %v1229_v54 }
 0x179   :  { %v345_v14 = vpop.permute.xlu1 %344  ;;  %v1202_v34 = vsel %vm386_vm3, %v369_v38, %v371_v60  ;;  %v1205_v41 = vsel %vm386_vm3, %v371_v60, %v373_v43  ;;  %v499_v38 = vmul.f32 %v830_v24, %v1193_v17  ;;  %v489_v60 = vmul.f32 %v807_v18, %v1238_v62 }
 0x17a   :  { %v500_v9 = vmul.f32 %v833_v25, %v1202_v34  ;;  %v501_v57 = vmul.f32 %v807_v18, %v1205_v41 }
 0x17c   :  { %587 = vmatprep.subr.mxu0 %v500_v9  ;;  %659 = vmatpush1.msra.mxu1 %v501_v57 }
 0x17d   :  { %v292_v63 = vpop.permute.xlu0 %291  ;;  %588 = vmatpush1.msra.mxu0 %v499_v38  ;;  %660 = vmatprep.subr.mxu1 %v498_v58  ;;  %v1274_v58 = vsel %vm386_vm3, %v1136_v2, %v1142_v10 }
 0x17e   :  { %v349_v43 = vpop.permute.xlu1 %348  ;;  %589 = vmatprep.subr.mxu0 %v496_v0  ;;  %661 = vmatpush1.msra.mxu1 %v497_v1  ;;  %v1269_v9 = vsel %vm386_vm3, %v292_v63, %v345_v14  ;;  %v1285_v0 = vsel %vm386_vm3, %v1138_v3, %v1136_v2  ;;  %v1290_v1 = vsel %vm386_vm3, %v1142_v10, %v1140_v6 }
 0x17f   :  { %v1250_v23 = vsel %vm386_vm3, %v349_v43, %v292_v63  ;;  %590 = vmatpush1.msra.mxu0 %v495_v36  ;;  %662 = vmatprep.subr.mxu1 %v973_v45  ;;  %v1266_v45 = vsel %vm386_vm3, %v1140_v6, %v1138_v3  ;;  %v480_v2 = vmul.f32 %v833_v25, %v1274_v58 }
 0x180   :  { %591 = vmatprep.subr.mxu0 %v979_v49  ;;  %663 = vmatpush1.msra.mxu1 %v493_v55  ;;  %v486_v61 = vmul.f32 %v810_v19, %v1250_v23  ;;  %v482_v63 = vmul.f32 %v810_v19, %v1266_v45  ;;  %v483_v55 = vmul.f32 %v830_v24, %v1269_v9 }
 0x181   :  { %592 = vmatpush1.msra.mxu0 %v941_v31  ;;  %664 = vmatprep.subr.mxu1 %v490_v8  ;;  %v479_v10 = vmul.f32 %v830_v24, %v1285_v0 }
 0x182   :  { %v333_v57 = vpop.permute.xlu1 %332  ;;  %v347_v49 = vpop.permute.xlu0 %346  ;;  %593 = vmatprep.subr.mxu0 %v488_v16  ;;  %665 = vmatpush1.msra.mxu1 %v489_v60 }
 0x183   :  { %v1277_v31 = vsel %vm386_vm3, %v345_v14, %v347_v49  ;;  %v1280_v38 = vsel %vm386_vm3, %v347_v49, %v349_v43  ;;  %594 = vmatpush1.msra.mxu0 %v487_v59  ;;  %666 = vmatprep.subr.mxu1 %v486_v61  ;;  %v481_v43 = vmul.f32 %v807_v18, %v1290_v1 }
 0x184   :  { %v484_v36 = vmul.f32 %v833_v25, %v1277_v31  ;;  %v485_v14 = vmul.f32 %v807_v18, %v1280_v38 }
 0x186   :  { %v337_v3 = vpop.permute.xlu1 %336  ;;  %595 = vmatprep.subr.mxu0 %v484_v36  ;;  %667 = vmatpush1.msra.mxu1 %v485_v14  ;;  %v288_v6 = vpop.permute.xlu0 %287 }
 0x187   :  { %v1307_v8 = vsel %vm386_vm3, %v337_v3, %v288_v6  ;;  %596 = vmatpush1.msra.mxu0 %v483_v55  ;;  %668 = vmatprep.subr.mxu1 %v482_v63  ;;  %v1312_v60 = vsel %vm386_vm3, %v288_v6, %v333_v57  ;;  %v562_v63 = vmul.f32 %v816_v21, %v1153_v30 }
 0x188   :  { %v478_v16 = vmul.f32 %v810_v19, %v1307_v8  ;;  %597 = vmatprep.subr.mxu0 %v480_v2  ;;  %669 = vmatpush1.msra.mxu1 %v481_v43  ;;  %v475_v14 = vmul.f32 %v830_v24, %v1312_v60  ;;  %v561_v55 = vmul.f32 %v813_v20, %v1145_v13 }
 0x189   :  { %598 = vmatpush1.msra.mxu0 %v479_v10  ;;  %v559_v24 = vmul.f32 %v836_v26, %v1162_v12  ;;  %v557_v30 = vmul.f32 %v813_v20, %v1150_v35  ;;  %v556_v2 = vmul.f32 %v839_v27, %v1159_v46  ;;  %v555_v13 = vmul.f32 %v836_v26, %v1156_v40 }
 0x18a   :  { %670 = vmatprep.subr.mxu1 %v478_v16  ;;  %v335_v59 = vpop.permute.xlu0 %334  ;;  %v553_v12 = vmul.f32 %v813_v20, %v1185_v56  ;;  %v550_v35 = vmul.f32 %v816_v21, %v1208_v4  ;;  %v551_v46 = vmul.f32 %v836_v26, %v1202_v34  ;;  %v549_v40 = vmul.f32 %v813_v20, %v1190_v22 }
 0x18b   :  { %v1315_v61 = vsel %vm386_vm3, %v333_v57, %v335_v59  ;;  %v1318_v49 = vsel %vm386_vm3, %v335_v59, %v337_v3  ;;  %v732_v57 = vmov 1.0   ;;  %v547_v56 = vmul.f32 %v836_v26, %v1196_v7 }
 0x18c   :  { %v476_v36 = vmul.f32 %v833_v25, %v1315_v61  ;;  %v477_v19 = vmul.f32 %v807_v18, %v1318_v49  ;;  %v560_v25 = vmul.f32 %v839_v27, %v1165_v47  ;;  %v558_v18 = vmul.f32 %v816_v21, %v1168_v15 }
 0x18d   :  { %v554_v47 = vmul.f32 %v816_v21, %v1193_v17  ;;  %v552_v15 = vmul.f32 %v839_v27, %v1205_v41  ;;  %v548_v17 = vmul.f32 %v839_v27, %v1199_v11  ;;  %v544_v41 = vmul.f32 %v839_v27, %v1217_v53 }
 0x18e   :  { %599 = vmatprep.subr.mxu0 %v476_v36  ;;  %671 = vmatpush1.msra.mxu1 %v477_v19  ;;  %v542_v34 = vmul.f32 %v816_v21, %v1245_v42  ;;  %v541_v22 = vmul.f32 %v813_v20, %v1229_v54  ;;  %v540_v11 = vmul.f32 %v839_v27, %v1238_v62 }
 0x18f   :  { %600 = vmatpush1.msra.mxu0 %v475_v14  ;;  %680 = vmatprep.subr.mxu1 %v732_v57  ;;  %v539_v7 = vmul.f32 %v836_v26, %v1235_v39  ;;  %v538_v4 = vmul.f32 %v816_v21, %v1269_v9  ;;  %v536_v53 = vmul.f32 %v839_v27, %v1280_v38 }
 0x190   :  { %609 = vmatprep.subr.mxu0 %v732_v57  ;;  %681 = vmatpush2.msra.mxu1 %v732_v57  ;;  %v535_v54 = vmul.f32 %v836_v26, %v1277_v31  ;;  %v532_v39 = vmul.f32 %v839_v27, %v1290_v1  ;;  %v531_v62 = vmul.f32 %v836_v26, %v1274_v58 }
 0x191   :  { %610 = vmatpush2.msra.mxu0 %v732_v57  ;;  %682 = vmatprep.subr.mxu1 %v562_v63  ;;  %v530_v42 = vmul.f32 %v816_v21, %v1312_v60  ;;  %v528_v9 = vmul.f32 %v839_v27, %v1318_v49 }
 0x192   :  { %611 = vmatprep.subr.mxu0 %v560_v25  ;;  %683 = vmatpush2.msra.mxu1 %v561_v55 }
 0x193   :  { %612 = vmatpush2.msra.mxu0 %v559_v24  ;;  %684 = vmatprep.subr.mxu1 %v558_v18 }
 0x194   :  { %613 = vmatprep.subr.mxu0 %v556_v2  ;;  %685 = vmatpush2.msra.mxu1 %v557_v30 }
 0x195   :  { %614 = vmatpush2.msra.mxu0 %v555_v13  ;;  %686 = vmatprep.subr.mxu1 %v554_v47 }
 0x196   :  { %615 = vmatprep.subr.mxu0 %v552_v15  ;;  %687 = vmatpush2.msra.mxu1 %v553_v12 }
 0x197   :  { %616 = vmatpush2.msra.mxu0 %v551_v46  ;;  %688 = vmatprep.subr.mxu1 %v550_v35 }
 0x198   :  { %617 = vmatprep.subr.mxu0 %v548_v17  ;;  %689 = vmatpush2.msra.mxu1 %v549_v40 }
 0x199   :  { %618 = vmatpush2.msra.mxu0 %v547_v56  ;;  %690 = vmatprep.subr.mxu1 %v944_v32  ;;  %v537_v32 = vmul.f32 %v813_v20, %v1250_v23  ;;  %v529_v23 = vmul.f32 %v813_v20, %v1307_v8 }
 0x19a   :  { %619 = vmatprep.subr.mxu0 %v544_v41  ;;  %691 = vmatpush2.msra.mxu1 %v976_v48  ;;  %v534_v48 = vmul.f32 %v816_v21, %v1285_v0 }
 0x19b   :  { %620 = vmatpush2.msra.mxu0 %v982_v50  ;;  %692 = vmatprep.subr.mxu1 %v542_v34  ;;  %v533_v50 = vmul.f32 %v813_v20, %v1266_v45  ;;  %v527_v45 = vmul.f32 %v836_v26, %v1315_v61  ;;  %v563_v20 = vld [vmem:[%s1421_s3] sm:$0xff] }
 0x19c   :  { %621 = vmatprep.subr.mxu0 %v540_v11  ;;  %693 = vmatpush2.msra.mxu1 %v541_v22 }
 0x19d   :  { %622 = vmatpush2.msra.mxu0 %v539_v7  ;;  %694 = vmatprep.subr.mxu1 %v538_v4 }
 0x19e   :  { %623 = vmatprep.subr.mxu0 %v536_v53  ;;  %695 = vmatpush2.msra.mxu1 %v537_v32 }
 0x19f   :  { %624 = vmatpush2.msra.mxu0 %v535_v54  ;;  %696 = vmatprep.subr.mxu1 %v534_v48 }
 0x1a0   :  { %625 = vmatprep.subr.mxu0 %v532_v39  ;;  %697 = vmatpush2.msra.mxu1 %v533_v50 }
 0x1a1   :  { %626 = vmatpush2.msra.mxu0 %v531_v62  ;;  %698 = vmatprep.subr.mxu1 %v530_v42 }
 0x1a2   :  { %627 = vmatprep.subr.mxu0 %v528_v9  ;;  %699 = vmatpush2.msra.mxu1 %v529_v23 }
 0x1a3   :  { %628 = vmatpush2.msra.mxu0 %v527_v45  ;;  %700 = vmatprep.subr.mxu1 %v1062_v28 }
 0x1a4   :  { %629 = vmatprep.subr.mxu0 %v1074_v44  ;;  %701 = vmatpush2.msra.mxu1 %v1065_v29 }
 0x1a5   :  { %630 = vmatpush2.msra.mxu0 %v1055_v5  ;;  %702 = vmatprep.subr.mxu1 %v962_v37 }
 0x1a6   :  { %631 = vmatprep.subr.mxu0 %v989_v51  ;;  %703 = vmatpush2.msra.mxu1 %v992_v52 }
 0x1a7   :  { %632 = vmatpush2.msra.mxu0 %v947_v33  ;;  %705 = vmatmul.mubr.f32.vlgmr.msra.gmra.mxu1 %v563_v20 }
 0x1a8   :  { %634 = vmatmul.mubr.f32.vlgmr.msra.gmra.mxu0 %v563_v20 }
 0x267   :  { %v706_v21 = vpop.f32.mrf.mxu1 }
 0x268   :  { %713 = vst [vmem:[%s1422_s4 + $0x10] sm:$0xff] %v706_v21  ;;  %v635_v26 = vpop.f32.mrf.mxu0 }
 0x269   :  { %711 = vst [vmem:[%s1422_s4] sm:$0xff] %v635_v26  ;;  %v708_v27 = vpop.f32.mrf.mxu1 }
 0x26a   :  { %714 = vst [vmem:[%s1422_s4 + $0x18] sm:$0xff] %v708_v27  ;;  %v637_v37 = vpop.f32.mrf.mxu0 }
 0x26b   :  { %712 = vst [vmem:[%s1422_s4 + $0x8] sm:$0xff] %v637_v37 }

</bundles_post_ra>
